<compile_context>
chip_gen: v5e
topology: v5e:2x2
jax: 0.10.0
libtpu: 0.0.40
codegen_flags: <defaults>
</compile_context>

<pallas_src>
import numpy as np
import jax
import jax.numpy as jnp
from jax.experimental import pallas as pl
from jax.experimental.pallas import tpu as pltpu

EPS = 1e-5
LATENT_DIM = 256
GLOBAL_DIM = 1024
HIDDEN = 512
POOL_PCN = 256          # width of the max-pooled SharedPCN feature (conv2 output)
POOL_DSF = 256          # width of the max-pooled DeepSDF feature (conv3 output)
POOLED_DIM = POOL_PCN + POOL_DSF   # 512
WEIGHT_DTYPE = jnp.bfloat16


# --------------------------------------------------------------------------
# Generation-aware sizing (v7x has 64 MiB VMEM per TensorCore; v5e/v6e 128 MiB)
# --------------------------------------------------------------------------
def _tpu_vmem_capacity_bytes():
    try:
        info = pltpu.get_tpu_info()
        return int(getattr(info, "vmem_capacity_bytes", 128 * 1024 * 1024))
    except Exception:
        return 128 * 1024 * 1024


_VMEM_CAP = _tpu_vmem_capacity_bytes()
_SMALL_VMEM = _VMEM_CAP <= 64 * 1024 * 1024
VMEM_LIMIT = (30 if _SMALL_VMEM else 48) * 1024 * 1024
MAX_QUERY_TILE = 1024 if _SMALL_VMEM else 2048


# --------------------------------------------------------------------------
# One-time feature probe for single-buffered constant weights (pl.Buffered(1)).
# --------------------------------------------------------------------------
_SINGLE_BUFFER_OK = None


def _probe_single_buffer():
    def k(w_ref, x_ref, o_ref):
        o_ref[...] = x_ref[...] + w_ref[...]
    try:
        x = jnp.zeros((2, 8, 128), jnp.float32)
        w = jnp.zeros((8, 128), jnp.float32)
        fn = pl.pallas_call(
            k,
            out_shape=jax.ShapeDtypeStruct((2, 8, 128), jnp.float32),
            grid=(2,),
            in_specs=[pl.BlockSpec((8, 128), lambda i: (0, 0),
                                   pipeline_mode=pl.Buffered(1)),
                      pl.BlockSpec((1, 8, 128), lambda i: (i, 0, 0))],
            out_specs=pl.BlockSpec((1, 8, 128), lambda i: (i, 0, 0)))
        jax.block_until_ready(fn(w, x))
        return True
    except Exception:
        return False


def _single_buffer_ok():
    global _SINGLE_BUFFER_OK
    if _SINGLE_BUFFER_OK is None:
        _SINGLE_BUFFER_OK = _probe_single_buffer()
    return _SINGLE_BUFFER_OK


def _const_spec(shape, single_buffer):
    """BlockSpec for a weight that is identical at every grid step."""
    index_map = lambda *_: (0,) * len(shape)
    if single_buffer:
        return pl.BlockSpec(shape, index_map, pipeline_mode=pl.Buffered(1))
    return pl.BlockSpec(shape, index_map)


def _pick_point_tile(n):
    for t in (2048, 1024, 512, 256, 128):
        if n % t == 0:
            return t
    return n  # full-extent lane block is always legal


def _pick_query_tile(m):
    if m <= 128:
        return m
    for t in (2048, 1024, 512, 256, 128):
        if t <= MAX_QUERY_TILE and m % t == 0:
            return t
    return 128 if m < 1024 else min(MAX_QUERY_TILE, 1024)  # pad M up to tile


# --------------------------------------------------------------------------
# Kernel 1: per-point encoders, channels-first, running max-pool.
#   grid = (B*S, N // tn); points are (3, tn) lane-dense, pooled features are
#   accumulated as a running max in the (1, 512, 1) output block.
# --------------------------------------------------------------------------
def _point_encoder_kernel(pts_ref, wf1, bf1, pw2, pb2, dw2, db2, dw3, db3, out_ref):
    f32, bf16 = jnp.float32, jnp.bfloat16
    relu = jax.nn.relu

    @pl.when(pl.program_id(1) == 0)
    def _():
        out_ref[...] = jnp.full(out_ref.shape, -jnp.inf, dtype=out_ref.dtype)

    x = pts_ref[0].astype(bf16)                                           # (3, tn)

    # fused SharedPCN conv1 + DeepSDF conv1 (both K=3, BN folded, eval mode)
    a = relu(jnp.dot(wf1[...], x, preferred_element_type=f32) + bf1[...])  # (192, tn)
    h = a[:128].astype(bf16)                                               # (128, tn)
    e = a[128:].astype(bf16)                                               # (64, tn)

    # SharedPCN conv2
    h = relu(jnp.dot(pw2[...], h, preferred_element_type=f32) + pb2[...])  # (256, tn)
    # DeepSDF conv2-3
    e = relu(jnp.dot(dw2[...], e, preferred_element_type=f32) + db2[...])  # (128, tn)
    e = relu(jnp.dot(dw3[...], e.astype(bf16),
                     preferred_element_type=f32) + db3[...])               # (256, tn)

    cur = jnp.concatenate([jnp.max(h, axis=1, keepdims=True),
                           jnp.max(e, axis=1, keepdims=True)], axis=0)     # (512, 1)
    out_ref[0] = jnp.maximum(out_ref[0], cur)


def point_encoder_forward(pts, p, tn=None):
    """pts: (B, S, N, 3) -> pooled features (B*S, 512, 1), channels-first."""
    B, S, N, _ = pts.shape
    BS = B * S
    if tn is None:
        tn = _pick_point_tile(N)
    assert N % tn == 0 and (tn == N or tn % 128 == 0), "point tile must be lane-aligned"

    # lane-dense, contiguous point blocks: (B*S, 3, N)
    pts_cf = jnp.transpose(pts.reshape(BS, N, 3), (0, 2, 1))

    wkeys = ('k1_wf1', 'k1_bf1', 'k1_pw2', 'k1_pb2',
             'k1_dw2', 'k1_db2', 'k1_dw3', 'k1_db3')
    weights = [p[k] for k in wkeys]
    sb = _single_buffer_ok()
    w_specs = [_const_spec(w.shape, sb) for w in weights]

    return pl.pallas_call(
        _point_encoder_kernel,
        out_shape=jax.ShapeDtypeStruct((BS, POOLED_DIM, 1), jnp.float32),
        grid_spec=pltpu.PrefetchScalarGridSpec(
            num_scalar_prefetch=0,
            grid=(BS, N // tn),
            in_specs=[pl.BlockSpec((1, 3, tn), lambda i, n: (i, 0, n))] + w_specs,
            out_specs=pl.BlockSpec((1, POOLED_DIM, 1), lambda i, n: (i, 0, 0))),
        compiler_params=pltpu.CompilerParams(
            dimension_semantics=("parallel", "arbitrary"),
            vmem_limit_bytes=VMEM_LIMIT),
    )(pts_cf, *weights)


# --------------------------------------------------------------------------
# Kernel 2: fusion head.  Small MLPs batched over all B*S sweeps; mean over
#   sweeps via an averaging matmul.  Also emits the per-batch effective fc1/fc4
#   decoder biases (latent contribution folded in) so kernel 3 needs no extra
#   XLA dispatches in between.
# --------------------------------------------------------------------------
def _fusion_head_kernel(pooled_ref, avg_ref,
                        pw3, pb3, pw4, pb4, dfw1, dfb1, dfw2, dfb2,
                        fw1g, fw1l, fb1, fw2, fb2,
                        w1lT, b1row, w4lT, b4row,
                        lat_ref, b1e_ref, b4e_ref):
    f32, bf16 = jnp.float32, jnp.bfloat16
    relu = jax.nn.relu

    pooled = pooled_ref[...]                               # (BS, 512) f32
    pcn = pooled[:, :POOL_PCN].astype(bf16)                # (BS, 256)
    dsf = pooled[:, POOL_PCN:].astype(bf16)                # (BS, 256)

    # SharedPCNEncoder conv3-4 (BN folded) + tanh -> global feature (BS, 1024)
    g = relu(jnp.dot(pcn, pw3[...], preferred_element_type=f32) + pb3[...])
    g = jnp.tanh(relu(jnp.dot(g.astype(bf16), pw4[...],
                              preferred_element_type=f32) + pb4[...]))

    # DeepSDFEncoder fc1-fc2 + tanh -> latent code (BS, 256)
    e = relu(jnp.dot(dsf, dfw1[...], preferred_element_type=f32) + dfb1[...])
    e = jnp.tanh(jnp.dot(e.astype(bf16), dfw2[...],
                         preferred_element_type=f32) + dfb2[...])

    # mean over sweeps via averaging matrix (B, BS) -- exact f32 mean
    avg = avg_ref[...]
    agg_g = jnp.dot(avg, g, preferred_element_type=f32)    # (B, 1024)
    agg_e = jnp.dot(avg, e, preferred_element_type=f32)    # (B, 256)

    # fusion MLP: Linear(1280,512)+ReLU+Linear(512,256), concat-free split weights
    fh = relu(jnp.dot(agg_g.astype(bf16), fw1g[...], preferred_element_type=f32)
              + jnp.dot(agg_e.astype(bf16), fw1l[...], preferred_element_type=f32)
              + fb1[...])
    latent = jnp.dot(fh.astype(bf16), fw2[...], preferred_element_type=f32) + fb2[...]
    lat_ref[...] = latent.astype(lat_ref.dtype)

    # decoder epilogue folded in: effective fc1/fc4 biases per batch element
    lat_bf = latent.astype(bf16)
    b1e_ref[...] = (jnp.dot(lat_bf, w1lT[...], preferred_element_type=f32)
                    + b1row[...]).astype(b1e_ref.dtype)
    b4e_ref[...] = (jnp.dot(lat_bf, w4lT[...], preferred_element_type=f32)
                    + b4row[...]).astype(b4e_ref.dtype)


_AVG_CACHE = {}


def _avg_matrix(B, S):
    key = (B, S)
    if key not in _AVG_CACHE:
        _AVG_CACHE[key] = jnp.asarray(
            np.repeat(np.eye(B, dtype=np.float32), S, axis=1) / float(S))
    return _AVG_CACHE[key]


def fusion_forward(pts, p, point_tile=None):
    """pts: (B, S, N, 3) -> (latent (B,256), b1e (B,512), b4e (B,512))."""
    B, S, _, _ = pts.shape
    pooled = point_encoder_forward(pts, p, tn=point_tile).reshape(B * S, POOLED_DIM)
    avg = _avg_matrix(B, S)
    wkeys = ('pw3', 'pb3', 'pw4', 'pb4', 'dfw1', 'dfb1', 'dfw2', 'dfb2',
             'fw1g', 'fw1l', 'fb1', 'fw2', 'fb2', 'w1lT', 'b1row', 'w4lT', 'b4row')
    weights = [p[k] for k in wkeys]
    latent, b1e, b4e = pl.pallas_call(
        _fusion_head_kernel,
        out_shape=(jax.ShapeDtypeStruct((B, LATENT_DIM), jnp.float32),
                   jax.ShapeDtypeStruct((B, HIDDEN), jnp.float32),
                   jax.ShapeDtypeStruct((B, HIDDEN), jnp.float32)),
    )(pooled, avg, *weights)
    return latent, b1e, b4e


# --------------------------------------------------------------------------
# Kernel 3: SDFDecoder, channels-first so the SDF output is lane-dense.
#   grid = (B, Mp // tm).  Activations are (C, tm) bf16 at each ReLU; the two
#   K=3 query matmuls are computed right where they are consumed; the latent
#   contributions of fc1/fc4 come pre-folded into the (B, 512, 2) `be` input.
# --------------------------------------------------------------------------
def _sdf_decoder_kernel(q_ref, be_ref,
                        w1q, w2, w3, w4h, w4q, w5, w6, w7, w8, bcols, b8,
                        out_ref):
    f32, bf16 = jnp.float32, jnp.bfloat16
    relu = jax.nn.relu

    q = q_ref[0].astype(bf16)                        # (3, tm) queries lane-dense
    be = be_ref[0]                                   # (512, 2) fc1/fc4 effective biases
    bias = lambda j: bcols[:, j:j + 1]               # packed (512, 1) bias columns

    # fc1: latent term folded into be[:, 0:1]
    h = relu(jnp.dot(w1q[...], q, preferred_element_type=f32) + be[:, 0:1]).astype(bf16)
    h = relu(jnp.dot(w2[...], h, preferred_element_type=f32) + bias(0)).astype(bf16)
    h = relu(jnp.dot(w3[...], h, preferred_element_type=f32) + bias(1)).astype(bf16)
    # fc4: cat([h, q, latent]) -> split matmuls; latent term folded into be[:, 1:2]
    h = relu(jnp.dot(w4h[...], h, preferred_element_type=f32)
             + jnp.dot(w4q[...], q, preferred_element_type=f32)
             + be[:, 1:2]).astype(bf16)
    # TODO(synk): nn.Dropout(0.2) is identity here (inference mode).
    h = relu(jnp.dot(w5[...], h, preferred_element_type=f32) + bias(2)).astype(bf16)
    h = relu(jnp.dot(w6[...], h, preferred_element_type=f32) + bias(3)).astype(bf16)
    h = relu(jnp.dot(w7[...], h, preferred_element_type=f32) + bias(4)).astype(bf16)
    sdf = jnp.dot(w8[...], h, preferred_element_type=f32) + b8[...]   # (1, tm)
    out_ref[0] = sdf.astype(out_ref.dtype)


def sdf_decoder_forward(query_points, b1e, b4e, p, tm=None):
    """query_points: (B, M, 3); b1e/b4e: (B, 512) -> sdf (B, M, 1)."""
    B, M, _ = query_points.shape
    if tm is None:
        tm = _pick_query_tile(M)
    Mp = ((M + tm - 1) // tm) * tm
    assert tm == Mp or tm % 128 == 0
    qp = query_points if Mp == M else jnp.pad(query_points,
                                              ((0, 0), (0, Mp - M), (0, 0)))

    # channels-first: query points live on the TPU lane axis (lane-dense stores)
    qpt = jnp.transpose(qp, (0, 2, 1))                                  # (B, 3, Mp)
    be = jnp.stack([b1e, b4e], axis=-1)                                 # (B, 512, 2)

    wkeys = ('w1q', 'w2', 'w3', 'w4h', 'w4q', 'w5', 'w6', 'w7', 'w8',
             'k3_bcols', 'k3_b8')
    weights = [p[k] for k in wkeys]
    sb = _single_buffer_ok()
    w_specs = [_const_spec(w.shape, sb) for w in weights]

    out = pl.pallas_call(
        _sdf_decoder_kernel,
        out_shape=jax.ShapeDtypeStruct((B, 1, Mp), jnp.float32),
        grid_spec=pltpu.PrefetchScalarGridSpec(
            num_scalar_prefetch=0,
            grid=(B, Mp // tm),
            in_specs=[pl.BlockSpec((1, 3, tm), lambda b, t: (b, 0, t)),
                      pl.BlockSpec((1, HIDDEN, 2), lambda b, t: (b, 0, 0))]
                     + w_specs,
            out_specs=pl.BlockSpec((1, 1, tm), lambda b, t: (b, 0, t))),
        compiler_params=pltpu.CompilerParams(
            dimension_semantics=("parallel", "parallel"),
            vmem_limit_bytes=VMEM_LIMIT),
    )(qpt, be, *weights)
    return out[:, 0, :M, None]                                          # (B, M, 1)


def mv_deepsdf_forward(multi_sweep_pcs, query_points, params,
                       point_tile=None, query_tile=None):
    latent, b1e, b4e = fusion_forward(multi_sweep_pcs, params, point_tile=point_tile)
    results = {'predicted_latent': latent}
    if query_points is not None:
        results['sdf_values'] = sdf_decoder_forward(query_points, b1e, b4e, params,
                                                    tm=query_tile)
    return results


# --------------------------------------------------------------------------
# Deterministic parameter construction (synthetic; BN folded in eval mode).
# Matmul weights are bf16, biases stay f32 (added after f32 MXU accumulation).
# Kernel-format views (channels-first / fused / packed) are built once here.
# --------------------------------------------------------------------------
def init_params(key):
    keys = iter(jax.random.split(key, 128))

    def w(shape, scale=0.1):
        return scale * jax.random.normal(next(keys), shape, dtype=jnp.float32)

    def bn(c):
        gamma = 1.0 + 0.1 * jax.random.normal(next(keys), (c,), jnp.float32)
        beta = 0.1 * jax.random.normal(next(keys), (c,), jnp.float32)
        mean = 0.1 * jax.random.normal(next(keys), (c,), jnp.float32)
        var = 1.0 + 0.1 * jnp.abs(jax.random.normal(next(keys), (c,), jnp.float32))
        return gamma, beta, mean, var

    def fold(wm, b, bn_params):
        gamma, beta, mean, var = bn_params
        scale = gamma / jnp.sqrt(var + EPS)
        return ((wm * scale[None, :]).astype(WEIGHT_DTYPE),
                (((b - mean) * scale) + beta)[None, :])

    P = {}
    # SharedPCNEncoder (weights (Cin, Cout), BN folded, eval mode)
    P['pw1'], P['pb1'] = fold(w((3, 128)), w((128,)), bn(128))
    P['pw2'], P['pb2'] = fold(w((128, 256)), w((256,)), bn(256))
    P['pw3'], P['pb3'] = fold(w((256, 512)), w((512,)), bn(512))
    P['pw4'], P['pb4'] = fold(w((512, GLOBAL_DIM)), w((GLOBAL_DIM,)), bn(GLOBAL_DIM))
    # DeepSDFEncoder
    P['dw1'], P['db1'] = fold(w((3, 64)), w((64,)), bn(64))
    P['dw2'], P['db2'] = fold(w((64, 128)), w((128,)), bn(128))
    P['dw3'], P['db3'] = fold(w((128, 256)), w((256,)), bn(256))
    P['dfw1'], P['dfb1'] = w((256, 512)).astype(WEIGHT_DTYPE), w((512,))[None, :]
    P['dfw2'], P['dfb2'] = w((512, LATENT_DIM)).astype(WEIGHT_DTYPE), w((LATENT_DIM,))[None, :]
    # Fusion MLP (fw1 split into global/latent halves -> concat-free in kernel)
    P['fw1g'] = w((GLOBAL_DIM, 512)).astype(WEIGHT_DTYPE)
    P['fw1l'] = w((LATENT_DIM, 512)).astype(WEIGHT_DTYPE)
    P['fb1'] = w((512,))[None, :]
    P['fw2'], P['fb2'] = w((512, LATENT_DIM)).astype(WEIGHT_DTYPE), w((LATENT_DIM,))[None, :]
    # SDFDecoder: PyTorch Linear layout (Cout, Cin), skip weights pre-split
    P['w1q'] = w((HIDDEN, 3)).astype(WEIGHT_DTYPE)
    P['w1l'] = w((HIDDEN, LATENT_DIM)).astype(WEIGHT_DTYPE)
    P['b1'] = w((HIDDEN,))
    for i in (2, 3, 5, 6, 7):
        P[f'w{i}'] = w((HIDDEN, HIDDEN)).astype(WEIGHT_DTYPE)
        P[f'b{i}'] = w((HIDDEN,))
    P['w4h'] = w((HIDDEN, HIDDEN)).astype(WEIGHT_DTYPE)
    P['w4q'] = w((HIDDEN, 3)).astype(WEIGHT_DTYPE)
    P['w4l'] = w((HIDDEN, LATENT_DIM)).astype(WEIGHT_DTYPE)
    P['b4'] = w((HIDDEN,))
    P['w8'] = w((1, HIDDEN)).astype(WEIGHT_DTYPE)
    P['b8'] = w((1,))

    # ---- kernel-format views (hoisted once out of the forward path) ----
    col = lambda b: b.reshape(-1, 1)
    # Kernel 1: channels-first weights; PCN conv1 + DeepSDF conv1 fused (192,3)
    P['k1_wf1'] = jnp.concatenate([P['pw1'].T, P['dw1'].T], axis=0)            # (192,3)
    P['k1_bf1'] = jnp.concatenate([P['pb1'][0], P['db1'][0]]).reshape(-1, 1)   # (192,1)
    P['k1_pw2'], P['k1_pb2'] = P['pw2'].T, col(P['pb2'][0])
    P['k1_dw2'], P['k1_db2'] = P['dw2'].T, col(P['db2'][0])
    P['k1_dw3'], P['k1_db3'] = P['dw3'].T, col(P['db3'][0])
    # Kernel 2 extras: fold fc1/fc4 latent terms into per-batch effective biases
    P['w1lT'], P['b1row'] = P['w1l'].T, P['b1'][None, :]
    P['w4lT'], P['b4row'] = P['w4l'].T, P['b4'][None, :]
    # Kernel 3: packed hidden biases (columns b2,b3,b5,b6,b7 of a (512,8) array)
    bpack = jnp.stack([P['b2'], P['b3'], P['b5'], P['b6'], P['b7']], axis=1)
    P['k3_bcols'] = jnp.concatenate([bpack, jnp.zeros((HIDDEN, 3), jnp.float32)], axis=1)
    P['k3_b8'] = P['b8'].reshape(1, 1)
    return P


# --------------------------------------------------------------------------
# Pure-JAX reference mirroring the kernel precision (bf16 operands, f32 accum).
# --------------------------------------------------------------------------
def ref_forward(pts, qp, P):
    f32, bf16 = jnp.float32, jnp.bfloat16
    relu = jax.nn.relu

    def mm(a, b):
        return jnp.dot(a.astype(bf16), b.astype(bf16), preferred_element_type=f32)

    # SharedPCNEncoder
    h = relu(mm(pts, P['pw1']) + P['pb1'])
    h = relu(mm(h, P['pw2']) + P['pb2'])
    g = h.max(axis=2)
    g = relu(mm(g, P['pw3']) + P['pb3'])
    g = jnp.tanh(relu(mm(g, P['pw4']) + P['pb4']))        # (B,S,1024)
    # DeepSDFEncoder
    e = relu(mm(pts, P['dw1']) + P['db1'])
    e = relu(mm(e, P['dw2']) + P['db2'])
    e = relu(mm(e, P['dw3']) + P['db3'])
    l = e.max(axis=2)
    l = relu(mm(l, P['dfw1']) + P['dfb1'])
    l = jnp.tanh(mm(l, P['dfw2']) + P['dfb2'])            # (B,S,256)
    # fusion
    agg = jnp.concatenate([g, l], axis=-1).mean(axis=1)   # (B,1280)
    fw1 = jnp.concatenate([P['fw1g'], P['fw1l']], axis=0)
    fh = relu(mm(agg, fw1) + P['fb1'])
    latent = mm(fh, P['fw2']) + P['fb2']                  # (B,256)
    # SDF decoder
    lat_e = latent[:, None, :]
    h1 = relu(mm(qp, P['w1q'].T) + mm(lat_e, P['w1l'].T) + P['b1'])
    h2 = relu(mm(h1, P['w2'].T) + P['b2'])
    h3 = relu(mm(h2, P['w3'].T) + P['b3'])
    h4 = relu(mm(h3, P['w4h'].T) + mm(qp, P['w4q'].T) + mm(lat_e, P['w4l'].T) + P['b4'])
    h5 = relu(mm(h4, P['w5'].T) + P['b5'])
    h6 = relu(mm(h5, P['w6'].T) + P['b6'])
    h7 = relu(mm(h6, P['w7'].T) + P['b7'])
    sdf = mm(h7, P['w8'].T) + P['b8']                     # (B,M,1)
    return latent, sdf


if __name__ == "__main__":
    key = jax.random.PRNGKey(0)
    kp, kx, kq = jax.random.split(key, 3)
    params = init_params(kp)

    B, S, N, M = 2, 3, 256, 256
    multi_sweep_pcs = jax.random.normal(kx, (B, S, N, 3), jnp.float32)
    query_points = jax.random.normal(kq, (B, M, 3), jnp.float32)

    # point_tile=128 -> 2 lane-aligned point tiles per sweep (exercises the running max);
    # query_tile=128 -> 2 query tiles per batch (lane-dense tiled decode, megacore-friendly).
    results = mv_deepsdf_forward(multi_sweep_pcs, query_points, params,
                                 point_tile=128, query_tile=128)
    jax.block_until_ready(results)

    ref_latent, ref_sdf = ref_forward(multi_sweep_pcs, query_points, params)
    assert results['predicted_latent'].shape == (B, LATENT_DIM)
    assert results['sdf_values'].shape == (B, M, 1)
    assert np.allclose(np.asarray(results['predicted_latent']),
                       np.asarray(ref_latent), atol=2e-2, rtol=2e-2)
    assert np.allclose(np.asarray(results['sdf_values']),
                       np.asarray(ref_sdf), atol=2e-2, rtol=2e-2)
    print("KERNEL_OK")
</pallas_src>

<mosaic_0001>
module attributes {stable_mosaic.version = 11 : i64} {
  func.func @k(%arg0: i32, %arg1: memref<8x128xf32, #tpu.memory_space<vmem>>, %arg2: memref<1x8x128xf32, #tpu.memory_space<vmem>>, %arg3: memref<1x8x128xf32, #tpu.memory_space<vmem>>) attributes {dimension_semantics = [#tpu.dimension_semantics<arbitrary>], iteration_bounds = array<i64: 2>, scalar_prefetch = 0 : i64, scratch_operands = 0 : i64, tpu.core_type = #tpu.core_type<tc>, window_params = [{pipeline_mode = #tpu.pipeline_mode<synchronous>, transform_indices = @transform_0, window_bounds = array<i64: 8, 128>}, {transform_indices = @transform_1, window_bounds = array<i64: 1, 8, 128>}, {transform_indices = @transform_2, window_bounds = array<i64: 1, 8, 128>}]} {
    %c0 = arith.constant 0 : index
    %c0_0 = arith.constant 0 : index
    %c0_1 = arith.constant 0 : index
    %0 = vector.load %arg2[%c0, %c0_0, %c0_1] : memref<1x8x128xf32, #tpu.memory_space<vmem>>, vector<1x8x128xf32>
    %c0_2 = arith.constant 0 : index
    %c0_3 = arith.constant 0 : index
    %1 = vector.load %arg1[%c0_2, %c0_3] : memref<8x128xf32, #tpu.memory_space<vmem>>, vector<8x128xf32>
    %2 = vector.shape_cast %1 : vector<8x128xf32> to vector<1x8x128xf32>
    %3 = arith.addf %0, %2 : vector<1x8x128xf32>
    %c0_4 = arith.constant 0 : index
    %c0_5 = arith.constant 0 : index
    %c0_6 = arith.constant 0 : index
    %4 = vector.load %arg3[%c0_4, %c0_5, %c0_6] : memref<1x8x128xf32, #tpu.memory_space<vmem>>, vector<1x8x128xf32>
    tpu.vector_store %arg3[%c0_4, %c0_5, %c0_6], %3 {strides = array<i32>} : memref<1x8x128xf32, #tpu.memory_space<vmem>>, vector<1x8x128xf32>,
    return
  }
  func.func @transform_0(%arg0: i32) -> (i32, i32) {
    %c0_i32 = arith.constant 0 : i32
    %c0_i32_0 = arith.constant 0 : i32
    %c0_i32_1 = arith.constant 0 : i32
    return %c0_i32, %c0_i32_0 : i32, i32
  }
  func.func @transform_1(%arg0: i32) -> (i32, i32, i32) {
    %c0_i32 = arith.constant 0 : i32
    %c0_i32_0 = arith.constant 0 : i32
    %c0_i32_1 = arith.constant 0 : i32
    return %arg0, %c0_i32, %c0_i32_0 : i32, i32, i32
  }
  func.func @transform_2(%arg0: i32) -> (i32, i32, i32) {
    %c0_i32 = arith.constant 0 : i32
    %c0_i32_0 = arith.constant 0 : i32
    %c0_i32_1 = arith.constant 0 : i32
    return %arg0, %c0_i32, %c0_i32_0 : i32, i32, i32
  }
}

module attributes {stable_mosaic.version = 11 : i64} {
  func.func @_point_encoder_kernel(%arg0: i32, %arg1: i32, %arg2: memref<1x3x128xf32, #tpu.memory_space<vmem>>, %arg3: memref<192x3xbf16, #tpu.memory_space<vmem>>, %arg4: memref<192x1xf32, #tpu.memory_space<vmem>>, %arg5: memref<256x128xbf16, #tpu.memory_space<vmem>>, %arg6: memref<256x1xf32, #tpu.memory_space<vmem>>, %arg7: memref<128x64xbf16, #tpu.memory_space<vmem>>, %arg8: memref<128x1xf32, #tpu.memory_space<vmem>>, %arg9: memref<256x128xbf16, #tpu.memory_space<vmem>>, %arg10: memref<256x1xf32, #tpu.memory_space<vmem>>, %arg11: memref<1x512x1xf32, #tpu.memory_space<vmem>>) attributes {dimension_semantics = [#tpu.dimension_semantics<parallel>, #tpu.dimension_semantics<arbitrary>], iteration_bounds = array<i64: 6, 2>, scalar_prefetch = 0 : i64, scratch_operands = 0 : i64, tpu.core_type = #tpu.core_type<tc>, window_params = [{transform_indices = @transform_0, window_bounds = array<i64: 1, 3, 128>}, {pipeline_mode = #tpu.pipeline_mode<synchronous>, transform_indices = @transform_1, window_bounds = array<i64: 192, 3>}, {pipeline_mode = #tpu.pipeline_mode<synchronous>, transform_indices = @transform_2, window_bounds = array<i64: 192, 1>}, {pipeline_mode = #tpu.pipeline_mode<synchronous>, transform_indices = @transform_3, window_bounds = array<i64: 256, 128>}, {pipeline_mode = #tpu.pipeline_mode<synchronous>, transform_indices = @transform_4, window_bounds = array<i64: 256, 1>}, {pipeline_mode = #tpu.pipeline_mode<synchronous>, transform_indices = @transform_5, window_bounds = array<i64: 128, 64>}, {pipeline_mode = #tpu.pipeline_mode<synchronous>, transform_indices = @transform_6, window_bounds = array<i64: 128, 1>}, {pipeline_mode = #tpu.pipeline_mode<synchronous>, transform_indices = @transform_7, window_bounds = array<i64: 256, 128>}, {pipeline_mode = #tpu.pipeline_mode<synchronous>, transform_indices = @transform_8, window_bounds = array<i64: 256, 1>}, {transform_indices = @transform_9, window_bounds = array<i64: 1, 512, 1>}]} {
    %c0_i32 = arith.constant 0 : i32
    %0 = arith.cmpi eq, %arg1, %c0_i32 : i32
    %1 = arith.extui %0 : i1 to i32
    %c0_i32_0 = arith.constant 0 : i32
    %2 = arith.cmpi ne, %1, %c0_i32_0 : i32
    scf.if %2 {
      %cst_34 = arith.constant 0xFF800000 : f32
      %50 = vector.broadcast %cst_34 : f32 to vector<1x512x1xf32>
      %c0_35 = arith.constant 0 : index
      %c0_36 = arith.constant 0 : index
      %c0_37 = arith.constant 0 : index
      %51 = vector.load %arg11[%c0_35, %c0_36, %c0_37] : memref<1x512x1xf32, #tpu.memory_space<vmem>>, vector<1x512x1xf32>
      tpu.vector_store %arg11[%c0_35, %c0_36, %c0_37], %50 {strides = array<i32>} : memref<1x512x1xf32, #tpu.memory_space<vmem>>, vector<1x512x1xf32>,
    } else {
    }
    %c0 = arith.constant 0 : index
    %c0_1 = arith.constant 0 : index
    %c0_2 = arith.constant 0 : index
    %3 = vector.load %arg2[%c0, %c0_1, %c0_2] : memref<1x3x128xf32, #tpu.memory_space<vmem>>, vector<1x3x128xf32>
    %4 = vector.shape_cast %3 : vector<1x3x128xf32> to vector<3x128xf32>
    %5 = arith.truncf %4 : vector<3x128xf32> to vector<3x128xbf16>
    %c0_3 = arith.constant 0 : index
    %c0_4 = arith.constant 0 : index
    %6 = vector.load %arg3[%c0_3, %c0_4] : memref<192x3xbf16, #tpu.memory_space<vmem>>, vector<192x3xbf16>
    %cst = arith.constant dense<0.000000e+00> : vector<192x128xf32>
    %7 = tpu.matmul %6, %5, %cst {dimension_numbers = #tpu.dot_dimension_numbers<[1], [0], [0], [1], [0, 0, 1, 1], [], []>} : vector<192x3xbf16>, vector<3x128xbf16>, vector<192x128xf32> -> vector<192x128xf32>
    %c0_5 = arith.constant 0 : index
    %c0_6 = arith.constant 0 : index
    %8 = vector.load %arg4[%c0_5, %c0_6] : memref<192x1xf32, #tpu.memory_space<vmem>>, vector<192x1xf32>
    %9 = vector.broadcast %8 : vector<192x1xf32> to vector<192x128xf32>
    %10 = arith.addf %7, %9 : vector<192x128xf32>
    %cst_7 = arith.constant 0.000000e+00 : f32
    %11 = vector.broadcast %cst_7 : f32 to vector<192x128xf32>
    %12 = arith.maximumf %10, %11 : vector<192x128xf32>
    %13 = vector.extract_strided_slice %12 {offsets = [0, 0], sizes = [128, 128], strides = [1, 1]} : vector<192x128xf32> to vector<128x128xf32>
    %14 = arith.truncf %13 : vector<128x128xf32> to vector<128x128xbf16>
    %15 = vector.extract_strided_slice %12 {offsets = [128, 0], sizes = [64, 128], strides = [1, 1]} : vector<192x128xf32> to vector<64x128xf32>
    %16 = arith.truncf %15 : vector<64x128xf32> to vector<64x128xbf16>
    %c0_8 = arith.constant 0 : index
    %c0_9 = arith.constant 0 : index
    %17 = vector.load %arg5[%c0_8, %c0_9] : memref<256x128xbf16, #tpu.memory_space<vmem>>, vector<256x128xbf16>
    %cst_10 = arith.constant dense<0.000000e+00> : vector<256x128xf32>
    %18 = tpu.matmul %17, %14, %cst_10 {dimension_numbers = #tpu.dot_dimension_numbers<[1], [0], [0], [1], [0, 0, 1, 1], [], []>} : vector<256x128xbf16>, vector<128x128xbf16>, vector<256x128xf32> -> vector<256x128xf32>
    %c0_11 = arith.constant 0 : index
    %c0_12 = arith.constant 0 : index
    %19 = vector.load %arg6[%c0_11, %c0_12] : memref<256x1xf32, #tpu.memory_space<vmem>>, vector<256x1xf32>
    %20 = vector.broadcast %19 : vector<256x1xf32> to vector<256x128xf32>
    %21 = arith.addf %18, %20 : vector<256x128xf32>
    %cst_13 = arith.constant 0.000000e+00 : f32
    %22 = vector.broadcast %cst_13 : f32 to vector<256x128xf32>
    %23 = arith.maximumf %21, %22 : vector<256x128xf32>
    %c0_14 = arith.constant 0 : index
    %c0_15 = arith.constant 0 : index
    %24 = vector.load %arg7[%c0_14, %c0_15] : memref<128x64xbf16, #tpu.memory_space<vmem>>, vector<128x64xbf16>
    %cst_16 = arith.constant dense<0.000000e+00> : vector<128x128xf32>
    %25 = tpu.matmul %24, %16, %cst_16 {dimension_numbers = #tpu.dot_dimension_numbers<[1], [0], [0], [1], [0, 0, 1, 1], [], []>} : vector<128x64xbf16>, vector<64x128xbf16>, vector<128x128xf32> -> vector<128x128xf32>
    %c0_17 = arith.constant 0 : index
    %c0_18 = arith.constant 0 : index
    %26 = vector.load %arg8[%c0_17, %c0_18] : memref<128x1xf32, #tpu.memory_space<vmem>>, vector<128x1xf32>
    %27 = vector.broadcast %26 : vector<128x1xf32> to vector<128x128xf32>
    %28 = arith.addf %25, %27 : vector<128x128xf32>
    %cst_19 = arith.constant 0.000000e+00 : f32
    %29 = vector.broadcast %cst_19 : f32 to vector<128x128xf32>
    %30 = arith.maximumf %28, %29 : vector<128x128xf32>
    %c0_20 = arith.constant 0 : index
    %c0_21 = arith.constant 0 : index
    %31 = vector.load %arg9[%c0_20, %c0_21] : memref<256x128xbf16, #tpu.memory_space<vmem>>, vector<256x128xbf16>
    %32 = arith.truncf %30 : vector<128x128xf32> to vector<128x128xbf16>
    %cst_22 = arith.constant dense<0.000000e+00> : vector<256x128xf32>
    %33 = tpu.matmul %31, %32, %cst_22 {dimension_numbers = #tpu.dot_dimension_numbers<[1], [0], [0], [1], [0, 0, 1, 1], [], []>} : vector<256x128xbf16>, vector<128x128xbf16>, vector<256x128xf32> -> vector<256x128xf32>
    %c0_23 = arith.constant 0 : index
    %c0_24 = arith.constant 0 : index
    %34 = vector.load %arg10[%c0_23, %c0_24] : memref<256x1xf32, #tpu.memory_space<vmem>>, vector<256x1xf32>
    %35 = vector.broadcast %34 : vector<256x1xf32> to vector<256x128xf32>
    %36 = arith.addf %33, %35 : vector<256x128xf32>
    %cst_25 = arith.constant 0.000000e+00 : f32
    %37 = vector.broadcast %cst_25 : f32 to vector<256x128xf32>
    %38 = arith.maximumf %36, %37 : vector<256x128xf32>
    %cst_26 = arith.constant dense<0xFF800000> : vector<256xf32>
    %39 = vector.multi_reduction <maximumf>, %23, %cst_26 [1] : vector<256x128xf32> to vector<256xf32>
    %40 = vector.shape_cast %39 : vector<256xf32> to vector<256x1xf32>
    %cst_27 = arith.constant dense<0xFF800000> : vector<256xf32>
    %41 = vector.multi_reduction <maximumf>, %38, %cst_27 [1] : vector<256x128xf32> to vector<256xf32>
    %42 = vector.shape_cast %41 : vector<256xf32> to vector<256x1xf32>
    %43 = tpu.concatenate %40, %42 in 0 : vector<256x1xf32>, vector<256x1xf32> -> vector<512x1xf32>
    %c0_28 = arith.constant 0 : index
    %c0_29 = arith.constant 0 : index
    %c0_30 = arith.constant 0 : index
    %44 = vector.load %arg11[%c0_28, %c0_29, %c0_30] : memref<1x512x1xf32, #tpu.memory_space<vmem>>, vector<1x512x1xf32>
    %45 = vector.shape_cast %44 : vector<1x512x1xf32> to vector<512x1xf32>
    %46 = arith.maximumf %45, %43 : vector<512x1xf32>
    %c0_31 = arith.constant 0 : index
    %c0_32 = arith.constant 0 : index
    %c0_33 = arith.constant 0 : index
    %47 = vector.load %arg11[%c0_31, %c0_32, %c0_33] : memref<1x512x1xf32, #tpu.memory_space<vmem>>, vector<1x512x1xf32>
    %48 = vector.shape_cast %47 : vector<1x512x1xf32> to vector<512x1xf32>
    %49 = vector.shape_cast %46 : vector<512x1xf32> to vector<1x512x1xf32>
    tpu.vector_store %arg11[%c0_31, %c0_32, %c0_33], %49 {strides = array<i32>} : memref<1x512x1xf32, #tpu.memory_space<vmem>>, vector<1x512x1xf32>,
    return
  }
  func.func @transform_0(%arg0: i32, %arg1: i32) -> (i32, i32, i32) {
    %c0_i32 = arith.constant 0 : i32
    %c0_i32_0 = arith.constant 0 : i32
    return %arg0, %c0_i32, %arg1 : i32, i32, i32
  }
  func.func @transform_1(%arg0: i32, %arg1: i32) -> (i32, i32) {
    %c0_i32 = arith.constant 0 : i32
    %c0_i32_0 = arith.constant 0 : i32
    %c0_i32_1 = arith.constant 0 : i32
    return %c0_i32, %c0_i32_0 : i32, i32
  }
  func.func @transform_2(%arg0: i32, %arg1: i32) -> (i32, i32) {
    %c0_i32 = arith.constant 0 : i32
    %c0_i32_0 = arith.constant 0 : i32
    %c0_i32_1 = arith.constant 0 : i32
    return %c0_i32, %c0_i32_0 : i32, i32
  }
  func.func @transform_3(%arg0: i32, %arg1: i32) -> (i32, i32) {
    %c0_i32 = arith.constant 0 : i32
    %c0_i32_0 = arith.constant 0 : i32
    %c0_i32_1 = arith.constant 0 : i32
    return %c0_i32, %c0_i32_0 : i32, i32
  }
  func.func @transform_4(%arg0: i32, %arg1: i32) -> (i32, i32) {
    %c0_i32 = arith.constant 0 : i32
    %c0_i32_0 = arith.constant 0 : i32
    %c0_i32_1 = arith.constant 0 : i32
    return %c0_i32, %c0_i32_0 : i32, i32
  }
  func.func @transform_5(%arg0: i32, %arg1: i32) -> (i32, i32) {
    %c0_i32 = arith.constant 0 : i32
    %c0_i32_0 = arith.constant 0 : i32
    %c0_i32_1 = arith.constant 0 : i32
    return %c0_i32, %c0_i32_0 : i32, i32
  }
  func.func @transform_6(%arg0: i32, %arg1: i32) -> (i32, i32) {
    %c0_i32 = arith.constant 0 : i32
    %c0_i32_0 = arith.constant 0 : i32
    %c0_i32_1 = arith.constant 0 : i32
    return %c0_i32, %c0_i32_0 : i32, i32
  }
  func.func @transform_7(%arg0: i32, %arg1: i32) -> (i32, i32) {
    %c0_i32 = arith.constant 0 : i32
    %c0_i32_0 = arith.constant 0 : i32
    %c0_i32_1 = arith.constant 0 : i32
    return %c0_i32, %c0_i32_0 : i32, i32
  }
  func.func @transform_8(%arg0: i32, %arg1: i32) -> (i32, i32) {
    %c0_i32 = arith.constant 0 : i32
    %c0_i32_0 = arith.constant 0 : i32
    %c0_i32_1 = arith.constant 0 : i32
    return %c0_i32, %c0_i32_0 : i32, i32
  }
  func.func @transform_9(%arg0: i32, %arg1: i32) -> (i32, i32, i32) {
    %c0_i32 = arith.constant 0 : i32
    %c0_i32_0 = arith.constant 0 : i32
    %c0_i32_1 = arith.constant 0 : i32
    return %arg0, %c0_i32, %c0_i32_0 : i32, i32, i32
  }
}

</mosaic_0001>

<bundles_post_ra>
// kernel: tpu_custom_call.1
= control target key start
LH: loop header
LB: loop body
LE: loop exit
PB: predicated region body
PF: predicated region fallthrough
CT: control target
= control target key end

     0   :  { %7 = vsyncpa [#allocation3], 0  ;;  %s635_s0 = inlined_call_operand.hbm [shape: f32[8,128], index: 0, kind: input, shape index: {}]   ;;  %s636_s1 = inlined_call_operand.hbm [shape: f32[2,8,128], index: 1, kind: input, shape index: {}]   ;;  %s637_s2 = inlined_call_operand.hbm [shape: f32[2,8,128], index: 2, kind: output, shape index: {}]  }
   0x1   :  { %8 = vsyncpa [#allocation6], 0 }
   0x2   :  { %10 = vsyncpa [#allocation6 + $0x1], 0 }
   0x3   :  { %11 = vsyncpa [#allocation4], 0 }
   0x4   :  { %13 = vsyncpa [#allocation4 + $0x1], 0  ;;  %s497_s9 = smov 0   ;;  %s499_s10 = smov 0  }
   0x5   :  { %s501_s11 = smov 0   ;;  %s503_s12 = smov 0  }
   0x6 LB: > { %s518_s13 = sadd.s32 4294967295, %s479_s12   ;;  %s278_s14 = sadd.s32 4294967294, %s479_s12   ;;  %s479_s12 = sphi %s503_s12, %s647_s12   ;;  %s475_s11 = sphi %s501_s11, %s646_s11   ;;  %s471_s10 = sphi %s499_s10, %s645_s10   ;;  %s467_s9 = sphi %s497_s9, %s644_s9  }
   0x7   : > { %p60_p0 = scmp.ne.s32.totalorder %s471_s10, %s467_s9  ;;  %p61_p1 = scmp.eq.s32.totalorder %s518_s13, 0 }
   0x8   : > { %p84_p2 = scmp.eq.s32.totalorder %s518_s13, 1  ;;  %p90_p3 = scmp.eq.s32.totalorder %s278_s14, 1 }
   0x9   : > { %p527_p4 = por %p61_p1, %p60_p0  ;;  %p279_p5 = scmp.ge.s32.totalorder %s479_s12, 1 }
   0xa   : > { %p532_p6 = por %p90_p3, %p60_p0  ;;  %p97_p7 = scmp.lt.s32.totalorder %s479_s12, 3 }
   0xb   : > { %s109_s19 = sshll.u32 %s635_s0, 4  ;;  %s481_s21 = smov [#allocation2]   ;;  %s110_s19 = int_to_ptr.hbm [resolvable:$true] %s109_s19 }
   0xc   : > { %p540_p8 = pnand %p279_p5, %p97_p7  ;;  %s111_s22 = sshll.u32 %s481_s21, 4  ;;  %s112_s22 = int_to_ptr.vmem [resolvable:$true] %s111_s22 }
   0xd   : > { %s550_s23 = sadd.s32 1, %s479_s12   ;;  %s47_s24 = sadd.s32 1, %s475_s11 }
   0xe   : > { %p300_p10 = pneg %p540_p8  ;;  %s44_s25 = ssub.s32 %s479_s12, %s550_s23 }
   0xf   : > { %p45_p12 = scmp.eq.s32.totalorder %s44_s25, 0  ;;  %p54_p13 = scmp.ne.s32.totalorder %s475_s11, %s471_s10 }
  0x10   : > { %p301_p11 = pnand %p300_p10, %p61_p1  ;;  %p55_p0 = scmp.eq.s32.totalorder %s479_s12, 0 }
  0x11   : > { %s559_s26 = scalar_select %p45_p12, %s475_s11, %s47_s24  }
  0x12   : > { %303 = dma.hbm_to_vmem [thread:$0]  (!%p301_p11), %s110_s19, 128, %s112_s22, [#allocation3]  }
  0x13   : > { %p563_p3 = por %p84_p2, %p54_p13  ;;  %p313_p5 = scmp.lt.s32.totalorder %s479_s12, 2 }
  0x14   : > { %s122_s28 = sand.u32 1, %s475_s11   ;;  %s283_s29 = sshll.u32 %s479_s12, 3 }
  0x15   : > { %p56_p7 = por %p55_p0, %p54_p13  ;;  %s282_s30 = sshll.u32 %s122_s28, 3 }
  0x16   : > { %s130_s5 = scalar_lea.hbm %s636_s1, %s283_s29  ;;  %s126_s7 = scalar_lea.vmem [#allocation5], %s282_s30 }
  0x17   : > { %s132_s6 = sshll.u32 %s130_s5, 4  ;;  %s134_s8 = sshll.u32 %s126_s7, 4  ;;  %s133_s6 = int_to_ptr.hbm [resolvable:$true] %s132_s6  ;;  %s135_s8 = int_to_ptr.vmem [resolvable:$true] %s134_s8 }
  0x18   : > { %p573_p10 = pnand %p313_p5, %p56_p7  ;;  %s123_s17 = scalar_lea.sflag [#allocation6], %s122_s28 }
  0x19   : > { %s379_s18 = sshra.s32 %s133_s6, 4  ;;  %s386_s24 = scalar_lea.hbm %s636_s1, 16  ;;  %s380_s18 = int_to_ptr.hbm [resolvable:$true] %s379_s18 }
  0x1a   : > { %s381_s19 = scalar_lea.hbm %s380_s18, 8  ;;  %p383_p11 = pneg %p573_p10 }
  0x1b   : > { %p382_p2 = scmp.ne.s32.totalorder %s380_s18, %s381_s19  ;;  %p387_p0 = scmp.lt.s32.totalorder %s380_s18, %s636_s1 }
  0x1c   : > { %p388_p5 = scmp.lt.s32.totalorder %s386_s24, %s381_s19 }
  0x1d   : > { %p384_p12 = pnand %p383_p11, %p382_p2 }
  0x1e   : > { %p389_p7 = por %p388_p5, %p387_p0 }
  0x1f   : > { %p385_p13 = pneg %p384_p12 }
  0x21   : > { %p390_p9 = pnand %p389_p7, %p385_p13 }
  0x23   : > { %393 = shalt.err (!%p390_p9)
}
  0x24   : > { %307 = dma.hbm_to_vmem [thread:$0]  (!%p573_p10), %s133_s6, 128, %s135_s8, %s123_s17  }
  0x25   : > { %143 = sbr.rel (%p540_p8) target bundleno = 62 (0x3e), region = 28 }
  0x2a   : > { %454 = dma.done.wait (%p61_p1), [#allocation3], 128  }
  0x2b   : > { %456 = vsyncadd (%p61_p1), [#allocation3], 4294967168  ;;  %s594_s28 = sand.u32 1, %s471_s10  }
  0x2c   : > { %s286_s30 = sshll.u32 %s594_s28, 3  ;;  %s151_s3 = scalar_lea.sflag [#allocation6], %s594_s28 }
  0x2d   : > { %s154_s4 = scalar_lea.vmem [#allocation5], %s286_s30 }
  0x2e   : > { %458 = dma.done.wait (%p527_p4), %s151_s3, 128  }
  0x2f   : > { %460 = vsyncadd (%p527_p4), %s151_s3, 4294967168  ;;  %s289_s20 = sshll.u32 %s518_s13, 3  ;;  %s175_s8 = scalar_lea.vmem [#allocation7], %s286_s30  ;;  %v176_v0 = vld [vmem:[%s154_s4] sm:$0xff]  ;;  %v177_v1 = vld [vmem:[#allocation2] sm:$0xff] }
  0x30   : > { %s191_s7 = scalar_lea.hbm %s637_s2, %s289_s20  ;;  %s193_s14 = sshll.u32 %s175_s8, 4  ;;  %v178_v2 = vadd.f32 %v177_v1, %v176_v0  ;;  %s194_s14 = int_to_ptr.vmem [resolvable:$true] %s193_s14 }
  0x31   : > { %s195_s17 = sshll.u32 %s191_s7, 4  ;;  %s181_s18 = scalar_lea.sflag [#allocation4], %s594_s28  ;;  %s196_s17 = int_to_ptr.hbm [resolvable:$true] %s195_s17 }
  0x32   : > { %179 = vst [vmem:[%s175_s8] sm:$0xff] %v178_v2  ;;  %s423_s15 = sshra.s32 %s196_s17, 4  ;;  %s429_s22 = scalar_lea.hbm %s637_s2, 16  ;;  %s424_s15 = int_to_ptr.hbm [resolvable:$true] %s423_s15 }
  0x33   : > { %s425_s19 = scalar_lea.hbm %s424_s15, 8  ;;  %p430_p9 = scmp.lt.s32.totalorder %s424_s15, %s637_s2 }
  0x34   : > { %p426_p1 = scmp.ne.s32.totalorder %s424_s15, %s425_s19  ;;  %p431_p10 = scmp.lt.s32.totalorder %s429_s22, %s425_s19 }
  0x36   : > { %p427_p4 = pnand %p426_p1, %p563_p3  ;;  %p432_p2 = por %p431_p10, %p430_p9 }
  0x38   : > { %p428_p8 = pneg %p427_p4 }
  0x3a   : > { %p433_p11 = pnand %p432_p2, %p428_p8 }
  0x3c   : > { %436 = shalt.err (!%p433_p11)
}
  0x3d   : > { %298 = dma.vmem_to_hbm [thread:$0]  (%p563_p3), %s194_s14, 128, %s196_s17, %s181_s18  }
  0x3e PF: > { %s207_s29 = sand.u32 1, %s467_s9   ;;  %p643_p12 = scmp.ge.s32.totalorder %s479_s12, 2 }
  0x3f   : > { %s208_s28 = scalar_lea.sflag [#allocation4], %s207_s29 }
  0x40   : > { %p309_p13 = pnand %p643_p12, %p532_p6 }
  0x42   : > { %p310_p0 = pneg %p309_p13 }
  0x44   : > { %462 = dma.done.wait (%p310_p0), %s208_s28, 128  }
  0x45   : > { %464 = vsyncadd (%p310_p0), %s208_s28, 4294967168  ;;  %p16_p5 = scmp.ge.s32.totalorder %s550_s23, 4   ;;  %s644_s9 = smov %s471_s10 }
  0x46   : > { %s645_s10 = smov %s475_s11  ;;  %s646_s11 = smov %s559_s26 }
  0x47   : > { %s647_s12 = smov %s550_s23  ;;  %18 = sbr.rel (!%p16_p5) target bundleno = 6 (0x6), region = 78 }
  0x4c   :  { %214 = vsyncpa [#allocation3], 1 }
  0x4d   :  { %216 = vsyncpa [#allocation3 + $0x1], 1 }
  0x4e   :  { %217 = vsyncpa [#allocation6], 1 }
  0x4f   :  { %219 = vsyncpa [#allocation6 + $0x1], 1 }
  0x50   :  { %220 = vsyncpa [#allocation4], 1 }
  0x51   :  { %222 = vsyncpa [#allocation4 + $0x1], 1 }

// kernel: tpu_custom_call.1
= control target key start
LH: loop header
LB: loop body
LE: loop exit
PB: predicated region body
PF: predicated region fallthrough
CT: control target
= control target key end

     0   :  { %s4305_s0 = inlined_call_operand.hbm [shape: f32[6,3,256], index: 0, kind: input, shape index: {}]   ;;  %s4306_s1 = inlined_call_operand.vmem [shape: bf16[192,3], index: 1, kind: input, shape index: {}]   ;;  %s4307_s2 = inlined_call_operand.vmem [shape: f32[192,1], index: 2, kind: input, shape index: {}]   ;;  %s4308_s3 = inlined_call_operand.hbm [shape: bf16[256,128], index: 3, kind: input, shape index: {}]   ;;  %s4309_s4 = inlined_call_operand.vmem [shape: f32[256,1], index: 4, kind: input, shape index: {}]   ;;  %s4310_s5 = inlined_call_operand.vmem [shape: bf16[128,64], index: 5, kind: input, shape index: {}]   ;;  %s4311_s6 = inlined_call_operand.vmem [shape: f32[128,1], index: 6, kind: input, shape index: {}]   ;;  %s4312_s7 = inlined_call_operand.hbm [shape: bf16[256,128], index: 7, kind: input, shape index: {}]   ;;  %s4313_s8 = inlined_call_operand.vmem [shape: f32[256,1], index: 8, kind: input, shape index: {}]   ;;  %s4314_s9 = inlined_call_operand.vmem [shape: f32[6,512,1], index: 9, kind: output, shape index: {}]  }
   0x1   :  { %4322 = sst [smem:[#allocation18_spill]] %s4306_s1 }
   0x2   :  { %4323 = sst [smem:[#allocation19_spill]] %s4308_s3 }
   0x3   :  { %4324 = sst [smem:[#allocation20_spill]] %s4309_s4 }
   0x4   :  { %4325 = sst [smem:[#allocation21_spill]] %s4310_s5 }
   0x5   :  { %4326 = sst [smem:[#allocation22_spill]] %s4311_s6 }
   0x6   :  { %4327 = sst [smem:[#allocation23_spill]] %s4312_s7 }
   0x7   :  { %4328 = sst [smem:[#allocation24_spill]] %s4313_s8 }
   0x8   :  { %14 = vsyncpa [#allocation3], 0 }
   0x9   :  { %16 = vsyncpa [#allocation3 + $0x1], 0 }
   0xa   :  { %17 = vsyncpa [#allocation5], 0  ;;  %s3044_s30 = smov 0   ;;  %s3046_s10 = smov 0  }
   0xb   :  { %s3048_s11 = smov 0   ;;  %s3050_s12 = smov 0  }
   0xc   :  { %s3052_s13 = smov 0   ;;  %s3054_s14 = smov 0  }
   0xd   :  { %s3056_s15 = smov 0   ;;  %s3058_s16 = smov 0  }
   0xe LB: > { %s2402_s17 = sadd.s32 4294967295, %s2985_s16   ;;  %p2404_p0 = scmp.ge.s32.totalorder %s2985_s16, 1  ;;  %s2985_s16 = sphi %s3058_s16, %s23_s16   ;;  %s2981_s15 = sphi %s3056_s15, %s4366_s15   ;;  %s2977_s14 = sphi %s3054_s14, %s4365_s14   ;;  %s2973_s13 = sphi %s3052_s13, %s4364_s13   ;;  %s2969_s12 = sphi %s3050_s12, %s4363_s12   ;;  %s2965_s11 = sphi %s3048_s11, %s4362_s11   ;;  %s2961_s10 = sphi %s3046_s10, %s4361_s10   ;;  %s2957_s30 = sphi %s3044_s30, %s4360_s30  }
   0xf   : > { %p3086_p1 = scmp.eq.s32.totalorder %s2402_s17, 0  ;;  %p262_p2 = scmp.lt.s32.totalorder %s2985_s16, 13 }
  0x10   : > { %s4330_s3 = sld [smem:[#allocation19_spill]]  ;;  %s2987_s23 = smov [#allocation4]  }
  0x11   : > { %p3094_p3 = pnand %p2404_p0, %p262_p2  ;;  %s281_s24 = sshll.u32 %s2987_s23, 4  ;;  %s282_s24 = int_to_ptr.vmem [resolvable:$true] %s281_s24 }
  0x12   : > { %s4332_s7 = sld [smem:[#allocation23_spill]]  ;;  %s2988_s28 = smov 64  }
  0x13   : > { %p2735_p4 = pneg %p3094_p3  ;;  %s2989_s29 = smov 4  }
  0x14   : > { %s2990_s17 = smov [#allocation6]   ;;  %s32_s20 = sadd.s32 1, %s2977_s14 }
  0x15   : > { %p2736_p5 = pnand %p2735_p4, %p3086_p1  ;;  %s304_s19 = sshll.u32 %s2990_s17, 4  ;;  %s305_s19 = int_to_ptr.vmem [resolvable:$true] %s304_s19 }
  0x16   : > { %s279_s21 = sshll.u32 %s4330_s3, 4  ;;  %s35_s23 = sadd.s32 1, %s2981_s15  ;;  %s280_s21 = int_to_ptr.hbm [resolvable:$true] %s279_s21 }
  0x17   : > { %2738 = dma.hbm_to_vmem [thread:$0]  (!%p2736_p5), %s280_s21, 2048, %s282_s24, [#allocation5], %s2988_s28, %s2988_s28, %s2989_s29  }
  0x18   : > { %s302_s27 = sshll.u32 %s4332_s7, 4  ;;  %p33_p6 = scmp.ge.s32.totalorder %s32_s20, 2  ;;  %s303_s27 = int_to_ptr.hbm [resolvable:$true] %s302_s27 }
  0x19   : > { %2741 = dma.hbm_to_vmem [thread:$0]  (!%p2736_p5), %s303_s27, 2048, %s305_s19, [#allocation5], %s2988_s28, %s2988_s28, %s2989_s29  }
  0x1a   : > { %s44_s25 = sadd.s32 1, %s2965_s11  ;;  %p51_p7 = scmp.ne.s32.totalorder %s2965_s11, %s2961_s10 }
  0x1b   : > { %p52_p8 = scmp.eq.s32.totalorder %s2985_s16, 0  ;;  %s4368_s20 = smov (%p33_p6, %s32_s20), 0 }
  0x1c   : > { %4333 = sst [smem:[#allocation9_spill]] %s4368_s20  ;;  %s4370_s23 = smov (!%p33_p6, %s35_s23), %s2981_s15 }
  0x1d   : > { %s40_s21 = ssub.s32 %s2977_s14, %s4368_s20  ;;  %p3116_p9 = por %p52_p8, %p51_p7 }
  0x1e   : > { %p37_p10 = scmp.ge.s32.totalorder %s4370_s23, 6  ;;  %p57_p11 = scmp.ne.s32.totalorder %s2961_s10, %s2957_s30 }
  0x1f   : > { %p2748_p12 = scmp.lt.s32.totalorder %s2985_s16, 12  ;;  %s321_s26 = sand.u32 1, %s2965_s11  }
  0x20   : > { %s4372_s23 = smov (%p37_p10, %s4370_s23), 0  ;;  %p3128_p13 = por %p3086_p1, %p57_p11 }
  0x21   : > { %4335 = sst [smem:[#allocation10_spill]] %s4372_s23  ;;  %s39_s28 = ssub.s32 %s2981_s15, %s4372_s23 }
  0x22   : > { %s2408_s29 = sshll.u32 %s321_s26, 2  ;;  %s41_s17 = sor.u32 %s40_s21, %s39_s28 }
  0x23   : > { %p42_p0 = scmp.eq.s32.totalorder %s41_s17, 0  ;;  %s2409_s19 = sshll.u32 %s2981_s15, 1 }
  0x24   : > { %s329_s3 = sadd.s32 %s2977_s14, %s2409_s19  ;;  %s325_s7 = scalar_lea.vmem [#allocation2], %s2408_s29 }
  0x25   : > { %s335_s30 = sshll.u32 %s325_s7, 4  ;;  %s2410_s5 = sshll.u32 %s329_s3, 2  ;;  %s336_s30 = int_to_ptr.vmem [resolvable:$true] %s335_s30 }
  0x26   : > { %s3137_s20 = scalar_select %p42_p0, %s2965_s11, %s44_s25  }
  0x27   : > { %s331_s4 = scalar_lea.hbm %s4305_s0, %s2410_s5  ;;  %p2743_p2 = pnand %p2748_p12, %p3116_p9 }
  0x28   : > { %s333_s1 = sshll.u32 %s331_s4, 4  ;;  %s322_s23 = scalar_lea.sflag [#allocation3], %s321_s26  ;;  %s334_s1 = int_to_ptr.hbm [resolvable:$true] %s333_s1 }
  0x29   : > { %2745 = dma.hbm_to_vmem [thread:$0]  (!%p2743_p2), %s334_s1, 64, %s336_s30, %s322_s23  }
  0x2a   : > { %344 = sbr.rel (%p3094_p3) target bundleno = 1211 (0x4bb), region = 56 }
  0x2f   : > { %s346_s7 = sand.u32 1, %s2961_s10  }
  0x30   : > { %s3149_s25 = sshll.u32 %s346_s7, 2  ;;  %s347_s3 = scalar_lea.sflag [#allocation3], %s346_s7 }
  0x31   : > { %s350_s21 = scalar_lea.vmem [#allocation2], %s3149_s25 }
  0x32   : > { %2948 = dma.done.wait (%p3128_p13), %s347_s3, 64  }
  0x33   : > { %2950 = vsyncadd (%p3128_p13), %s347_s3, 4294967232 }
  0x34   : > { %2952 = dma.done.wait (%p3086_p1), [#allocation5], 4096  }
  0x35   : > { %2954 = vsyncadd (%p3086_p1), [#allocation5], 4294963200  ;;  %p396_p3 = scmp.lt.s32.totalorder %s2973_s13, 5  ;;  %p2417_p4 = scmp.ne.s32.totalorder %s2969_s12, 0 }
  0x37   : > { %s4374_s13 = smov (!%p396_p3, %s2973_s13), 5  ;;  %405 = sbr.rel (%p2417_p4) target bundleno = 125 (0x7d), region = 72 }
  0x38   : > { %s2648_s1 = sshll.u32 %s4374_s13, 9 }
  0x39   : > { %s3165_s6 = scalar_lea.vmem %s4314_s9, %s2648_s1 }
  0x3c   : > { %vm406_vm0 = vcmask 7168   ;;  %v2991_v0 = vmov -inf  }
  0x3d   : > { %407 = vst.msk [vmem:[%s3165_s6] sm:$0xff] %vm406_vm0, %v2991_v0 }
  0x3e   : > { %408 = vst.msk [vmem:[%s3165_s6 + $0x8] sm:$0xff] %vm406_vm0, %v2991_v0 }
  0x3f   : > { %409 = vst.msk [vmem:[%s3165_s6 + $0x10] sm:$0xff] %vm406_vm0, %v2991_v0 }
  0x40   : > { %410 = vst.msk [vmem:[%s3165_s6 + $0x18] sm:$0xff] %vm406_vm0, %v2991_v0 }
  0x41   : > { %411 = vst.msk [vmem:[%s3165_s6 + $0x20] sm:$0xff] %vm406_vm0, %v2991_v0 }
  0x42   : > { %412 = vst.msk [vmem:[%s3165_s6 + $0x28] sm:$0xff] %vm406_vm0, %v2991_v0 }
  0x43   : > { %413 = vst.msk [vmem:[%s3165_s6 + $0x30] sm:$0xff] %vm406_vm0, %v2991_v0 }
  0x44   : > { %414 = vst.msk [vmem:[%s3165_s6 + $0x38] sm:$0xff] %vm406_vm0, %v2991_v0 }
  0x45   : > { %415 = vst.msk [vmem:[%s3165_s6 + $0x40] sm:$0xff] %vm406_vm0, %v2991_v0 }
  0x46   : > { %416 = vst.msk [vmem:[%s3165_s6 + $0x48] sm:$0xff] %vm406_vm0, %v2991_v0 }
  0x47   : > { %417 = vst.msk [vmem:[%s3165_s6 + $0x50] sm:$0xff] %vm406_vm0, %v2991_v0 }
  0x48   : > { %418 = vst.msk [vmem:[%s3165_s6 + $0x58] sm:$0xff] %vm406_vm0, %v2991_v0 }
  0x49   : > { %419 = vst.msk [vmem:[%s3165_s6 + $0x60] sm:$0xff] %vm406_vm0, %v2991_v0 }
  0x4a   : > { %420 = vst.msk [vmem:[%s3165_s6 + $0x68] sm:$0xff] %vm406_vm0, %v2991_v0 }
  0x4b   : > { %421 = vst.msk [vmem:[%s3165_s6 + $0x70] sm:$0xff] %vm406_vm0, %v2991_v0 }
  0x4c   : > { %422 = vst.msk [vmem:[%s3165_s6 + $0x78] sm:$0xff] %vm406_vm0, %v2991_v0 }
  0x4d   : > { %423 = vst.msk [vmem:[%s3165_s6 + $0x80] sm:$0xff] %vm406_vm0, %v2991_v0 }
  0x4e   : > { %424 = vst.msk [vmem:[%s3165_s6 + $0x88] sm:$0xff] %vm406_vm0, %v2991_v0 }
  0x4f   : > { %425 = vst.msk [vmem:[%s3165_s6 + $0x90] sm:$0xff] %vm406_vm0, %v2991_v0 }
  0x50   : > { %426 = vst.msk [vmem:[%s3165_s6 + $0x98] sm:$0xff] %vm406_vm0, %v2991_v0 }
  0x51   : > { %427 = vst.msk [vmem:[%s3165_s6 + $0xa0] sm:$0xff] %vm406_vm0, %v2991_v0 }
  0x52   : > { %428 = vst.msk [vmem:[%s3165_s6 + $0xa8] sm:$0xff] %vm406_vm0, %v2991_v0 }
  0x53   : > { %429 = vst.msk [vmem:[%s3165_s6 + $0xb0] sm:$0xff] %vm406_vm0, %v2991_v0 }
  0x54   : > { %430 = vst.msk [vmem:[%s3165_s6 + $0xb8] sm:$0xff] %vm406_vm0, %v2991_v0 }
  0x55   : > { %431 = vst.msk [vmem:[%s3165_s6 + $0xc0] sm:$0xff] %vm406_vm0, %v2991_v0 }
  0x56   : > { %432 = vst.msk [vmem:[%s3165_s6 + $0xc8] sm:$0xff] %vm406_vm0, %v2991_v0 }
  0x57   : > { %433 = vst.msk [vmem:[%s3165_s6 + $0xd0] sm:$0xff] %vm406_vm0, %v2991_v0 }
  0x58   : > { %434 = vst.msk [vmem:[%s3165_s6 + $0xd8] sm:$0xff] %vm406_vm0, %v2991_v0 }
  0x59   : > { %435 = vst.msk [vmem:[%s3165_s6 + $0xe0] sm:$0xff] %vm406_vm0, %v2991_v0 }
  0x5a   : > { %436 = vst.msk [vmem:[%s3165_s6 + $0xe8] sm:$0xff] %vm406_vm0, %v2991_v0 }
  0x5b   : > { %437 = vst.msk [vmem:[%s3165_s6 + $0xf0] sm:$0xff] %vm406_vm0, %v2991_v0 }
  0x5c   : > { %438 = vst.msk [vmem:[%s3165_s6 + $0xf8] sm:$0xff] %vm406_vm0, %v2991_v0 }
  0x5d   : > { %439 = vst.msk [vmem:[%s3165_s6 + $0x100] sm:$0xff] %vm406_vm0, %v2991_v0 }
  0x5e   : > { %440 = vst.msk [vmem:[%s3165_s6 + $0x108] sm:$0xff] %vm406_vm0, %v2991_v0 }
  0x5f   : > { %441 = vst.msk [vmem:[%s3165_s6 + $0x110] sm:$0xff] %vm406_vm0, %v2991_v0 }
  0x60   : > { %442 = vst.msk [vmem:[%s3165_s6 + $0x118] sm:$0xff] %vm406_vm0, %v2991_v0 }
  0x61   : > { %443 = vst.msk [vmem:[%s3165_s6 + $0x120] sm:$0xff] %vm406_vm0, %v2991_v0 }
  0x62   : > { %444 = vst.msk [vmem:[%s3165_s6 + $0x128] sm:$0xff] %vm406_vm0, %v2991_v0 }
  0x63   : > { %445 = vst.msk [vmem:[%s3165_s6 + $0x130] sm:$0xff] %vm406_vm0, %v2991_v0 }
  0x64   : > { %446 = vst.msk [vmem:[%s3165_s6 + $0x138] sm:$0xff] %vm406_vm0, %v2991_v0 }
  0x65   : > { %447 = vst.msk [vmem:[%s3165_s6 + $0x140] sm:$0xff] %vm406_vm0, %v2991_v0 }
  0x66   : > { %448 = vst.msk [vmem:[%s3165_s6 + $0x148] sm:$0xff] %vm406_vm0, %v2991_v0 }
  0x67   : > { %449 = vst.msk [vmem:[%s3165_s6 + $0x150] sm:$0xff] %vm406_vm0, %v2991_v0 }
  0x68   : > { %450 = vst.msk [vmem:[%s3165_s6 + $0x158] sm:$0xff] %vm406_vm0, %v2991_v0 }
  0x69   : > { %451 = vst.msk [vmem:[%s3165_s6 + $0x160] sm:$0xff] %vm406_vm0, %v2991_v0 }
  0x6a   : > { %452 = vst.msk [vmem:[%s3165_s6 + $0x168] sm:$0xff] %vm406_vm0, %v2991_v0 }
  0x6b   : > { %453 = vst.msk [vmem:[%s3165_s6 + $0x170] sm:$0xff] %vm406_vm0, %v2991_v0 }
  0x6c   : > { %454 = vst.msk [vmem:[%s3165_s6 + $0x178] sm:$0xff] %vm406_vm0, %v2991_v0 }
  0x6d   : > { %455 = vst.msk [vmem:[%s3165_s6 + $0x180] sm:$0xff] %vm406_vm0, %v2991_v0 }
  0x6e   : > { %456 = vst.msk [vmem:[%s3165_s6 + $0x188] sm:$0xff] %vm406_vm0, %v2991_v0 }
  0x6f   : > { %457 = vst.msk [vmem:[%s3165_s6 + $0x190] sm:$0xff] %vm406_vm0, %v2991_v0 }
  0x70   : > { %458 = vst.msk [vmem:[%s3165_s6 + $0x198] sm:$0xff] %vm406_vm0, %v2991_v0 }
  0x71   : > { %459 = vst.msk [vmem:[%s3165_s6 + $0x1a0] sm:$0xff] %vm406_vm0, %v2991_v0 }
  0x72   : > { %460 = vst.msk [vmem:[%s3165_s6 + $0x1a8] sm:$0xff] %vm406_vm0, %v2991_v0 }
  0x73   : > { %461 = vst.msk [vmem:[%s3165_s6 + $0x1b0] sm:$0xff] %vm406_vm0, %v2991_v0 }
  0x74   : > { %462 = vst.msk [vmem:[%s3165_s6 + $0x1b8] sm:$0xff] %vm406_vm0, %v2991_v0 }
  0x75   : > { %463 = vst.msk [vmem:[%s3165_s6 + $0x1c0] sm:$0xff] %vm406_vm0, %v2991_v0 }
  0x76   : > { %464 = vst.msk [vmem:[%s3165_s6 + $0x1c8] sm:$0xff] %vm406_vm0, %v2991_v0 }
  0x77   : > { %465 = vst.msk [vmem:[%s3165_s6 + $0x1d0] sm:$0xff] %vm406_vm0, %v2991_v0 }
  0x78   : > { %466 = vst.msk [vmem:[%s3165_s6 + $0x1d8] sm:$0xff] %vm406_vm0, %v2991_v0 }
  0x79   : > { %467 = vst.msk [vmem:[%s3165_s6 + $0x1e0] sm:$0xff] %vm406_vm0, %v2991_v0 }
  0x7a   : > { %468 = vst.msk [vmem:[%s3165_s6 + $0x1e8] sm:$0xff] %vm406_vm0, %v2991_v0 }
  0x7b   : > { %469 = vst.msk [vmem:[%s3165_s6 + $0x1f0] sm:$0xff] %vm406_vm0, %v2991_v0 }
  0x7c   : > { %470 = vst.msk [vmem:[%s3165_s6 + $0x1f8] sm:$0xff] %vm406_vm0, %v2991_v0 }
  0x7d PF: > { %v501_v1 = vld [vmem:[%s4307_s2 + $0x20] sm:$0xff]  ;;  %v499_v2 = vld [vmem:[%s4307_s2 + $0x10] sm:$0xff]  ;;  %vm738_vm1 = vcmask 1040384   ;;  %vm739_vm2 = vcmask 1041408   ;;  %v2992_v4 = vmov 0   ;;  %v2993_v7 = vmov 65535  }
  0x7e   : > { %v497_v3 = vld [vmem:[%s4307_s2] sm:$0xff]  ;;  %2824 = vset.pattern.permute.xlu2 %v2992_v4  ;;  %2823 = vset.pattern.permute.xlu1 %v2992_v4  ;;  %v740_v8 = vsel %vm738_vm1, 4294967295, %v2993_v7  ;;  %s4337_s27 = sld [smem:[#allocation18_spill]]  ;;  %vm701_vm3 = vcmask 23552   ;;  %v502_v12 = vld [vmem:[%s4307_s2 + $0x28] sm:$0xff]  ;;  %v500_v13 = vld [vmem:[%s4307_s2 + $0x18] sm:$0xff] }
  0x7f   : > { %v471_v5 = vld [vmem:[%s350_s21] sm:$0x7]  ;;  %2822 = vset.pattern.permute.xlu0 %v2992_v4  ;;  %543 = vperm.xlu2 %2824, %v501_v1   ;;  %v741_v9 = vsel %vm739_vm2, %v740_v8, 0  ;;  %v498_v14 = vld [vmem:[%s4307_s2 + $0x8] sm:$0xff]  ;;  %v512_v16 = vld [vmem:[%s4307_s2 + $0x78] sm:$0xff]  ;;  %s4338_s4 = sld [smem:[#allocation20_spill]] }
  0x80   : > { %v472_v6 = vpack.c.bf16 %v471_v5, %v471_v5  ;;  %533 = vperm.xlu1 %2823, %v499_v2   ;;  %523 = vperm.xlu0 %2822, %v497_v3   ;;  %v509_v15 = vld [vmem:[%s4307_s2 + $0x60] sm:$0xff]  ;;  %v511_v17 = vld [vmem:[%s4307_s2 + $0x70] sm:$0xff]  ;;  %v508_v19 = vld [vmem:[%s4307_s2 + $0x58] sm:$0xff]  ;;  %s4339_s30 = sld [smem:[#allocation22_spill]]  ;;  %vm1443_vm4 = vcmask 523264   ;;  %vm2238_vm5 = vcmask 7168  }
  0x81   : > { %v507_v20 = vld [vmem:[%s4307_s2 + $0x50] sm:$0xff]  ;;  %v510_v21 = vld [vmem:[%s4307_s2 + $0x68] sm:$0xff]  ;;  %v505_v24 = vld [vmem:[%s4307_s2 + $0x40] sm:$0xff]  ;;  %s4341_s12 = sld [smem:[#allocation24_spill]] }
  0x82   : > { %v743_v10 = vand.u32 %v741_v9, %v472_v6  ;;  %v503_v22 = vld [vmem:[%s4307_s2 + $0x30] sm:$0xff]  ;;  %v506_v23 = vld [vmem:[%s4307_s2 + $0x48] sm:$0xff]  ;;  %v513_v27 = vld [vmem:[%s4307_s2 + $0x80] sm:$0xff]  ;;  %s4343_s1 = sld [smem:[#allocation21_spill]] }
  0x83   : > { %v519_v26 = vld [vmem:[%s4307_s2 + $0xb0] sm:$0xff]  ;;  %v504_v28 = vld [vmem:[%s4307_s2 + $0x38] sm:$0xff]  ;;  %v518_v29 = vld [vmem:[%s4307_s2 + $0xa8] sm:$0xff] }
  0x84   : > { %v2649_v11 = vld [vmem:[%s4337_s27] sm:$0xff]  ;;  %752 = vmatpush.bf16.msra.mxu0 %v743_v10  ;;  %v2650_v18 = vld [vmem:[%s4337_s27 + $0x8] sm:$0xff]  ;;  %v2651_v25 = vld [vmem:[%s4337_s27 + $0x10] sm:$0xff] }
  0x85   : > { %v517_v30 = vld [vmem:[%s4307_s2 + $0xa0] sm:$0xff]  ;;  %v520_v31 = vld [vmem:[%s4307_s2 + $0xb8] sm:$0xff]  ;;  %v514_v33 = vld [vmem:[%s4307_s2 + $0x88] sm:$0xff] }
  0x86   : > { %v2652_v32 = vld [vmem:[%s4337_s27 + $0x18] sm:$0xff]  ;;  %v515_v35 = vld [vmem:[%s4307_s2 + $0x90] sm:$0xff]  ;;  %v883_v37 = vld [vmem:[%s4338_s4 + $0x8] sm:$0xff]  ;;  %s4340_s7 = smov %s4339_s30 }
  0x87   : > { %2466 = vmatmul.msk.bf16.vlgmr.msra.gmra.mxu0 %vm701_vm3, %v2649_v11  ;;  %548 = vperm.xlu2 %2824, %v502_v12   ;;  %v516_v34 = vld [vmem:[%s4307_s2 + $0x98] sm:$0xff]  ;;  %v884_v36 = vld [vmem:[%s4338_s4 + $0x10] sm:$0xff]  ;;  %v882_v38 = vld [vmem:[%s4338_s4] sm:$0xff]  ;;  %s4342_s18 = smov %s4341_s12 }
  0x88   : > { %538 = vperm.xlu1 %2823, %v500_v13   ;;  %528 = vperm.xlu0 %2822, %v498_v14   ;;  %v2653_v39 = vld [vmem:[%s4337_s27 + $0x20] sm:$0xff]  ;;  %v887_v40 = vld [vmem:[%s4338_s4 + $0x28] sm:$0xff]  ;;  %v885_v42 = vld [vmem:[%s4338_s4 + $0x18] sm:$0xff] }
  0x89   : > { %v886_v41 = vld [vmem:[%s4338_s4 + $0x20] sm:$0xff]  ;;  %v889_v44 = vld [vmem:[%s4338_s4 + $0x38] sm:$0xff]  ;;  %v888_v45 = vld [vmem:[%s4338_s4 + $0x30] sm:$0xff] }
  0x8a   : > { %v890_v43 = vld [vmem:[%s4338_s4 + $0x40] sm:$0xff]  ;;  %v2654_v46 = vld [vmem:[%s4337_s27 + $0x28] sm:$0xff]  ;;  %v893_v47 = vld [vmem:[%s4338_s4 + $0x58] sm:$0xff] }
  0x8b   : > { %v892_v48 = vld [vmem:[%s4338_s4 + $0x50] sm:$0xff]  ;;  %v891_v49 = vld [vmem:[%s4338_s4 + $0x48] sm:$0xff]  ;;  %v894_v52 = vld [vmem:[%s4338_s4 + $0x60] sm:$0xff] }
  0x8c   : > { %v896_v50 = vld [vmem:[%s4338_s4 + $0x70] sm:$0xff]  ;;  %v895_v51 = vld [vmem:[%s4338_s4 + $0x68] sm:$0xff]  ;;  %v898_v55 = vld [vmem:[%s4338_s4 + $0x80] sm:$0xff] }
  0x8d   : > { %v2655_v53 = vld [vmem:[%s4337_s27 + $0x30] sm:$0xff]  ;;  %v899_v54 = vld [vmem:[%s4338_s4 + $0x88] sm:$0xff]  ;;  %v897_v56 = vld [vmem:[%s4338_s4 + $0x78] sm:$0xff] }
  0x8e   : > { %v902_v57 = vld [vmem:[%s4338_s4 + $0xa0] sm:$0xff]  ;;  %v901_v58 = vld [vmem:[%s4338_s4 + $0x98] sm:$0xff]  ;;  %v900_v59 = vld [vmem:[%s4338_s4 + $0x90] sm:$0xff] }
  0x8f   : > { %583 = vperm.xlu2 %2824, %v509_v15   ;;  %v2656_v60 = vld [vmem:[%s4337_s27 + $0x38] sm:$0xff]  ;;  %v904_v62 = vld [vmem:[%s4338_s4 + $0xb0] sm:$0xff]  ;;  %v903_v63 = vld [vmem:[%s4338_s4 + $0xa8] sm:$0xff] }
  0x90   : > { %598 = vperm.xlu1 %2823, %v512_v16   ;;  %593 = vperm.xlu0 %2822, %v511_v17   ;;  %v905_v61 = vld [vmem:[%s4338_s4 + $0xb8] sm:$0xff]  ;;  %v908_v0 = vld [vmem:[%s4338_s4 + $0xd0] sm:$0xff]  ;;  %v907_v1 = vld [vmem:[%s4338_s4 + $0xc8] sm:$0xff] }
  0x91   : > { %v906_v2 = vld [vmem:[%s4338_s4 + $0xc0] sm:$0xff]  ;;  %v911_v5 = vld [vmem:[%s4338_s4 + $0xe8] sm:$0xff]  ;;  %v909_v7 = vld [vmem:[%s4338_s4 + $0xd8] sm:$0xff] }
  0x92   : > { %v2657_v3 = vld [vmem:[%s4337_s27 + $0x40] sm:$0xff]  ;;  %v913_v11 = vld [vmem:[%s4338_s4 + $0xf8] sm:$0xff]  ;;  %v912_v12 = vld [vmem:[%s4338_s4 + $0xf0] sm:$0xff] }
  0x93   : > { %v910_v6 = vld [vmem:[%s4338_s4 + $0xe0] sm:$0xff]  ;;  %v2658_v15 = vld [vmem:[%s4337_s27 + $0x48] sm:$0xff] }
  0x94   : > { %v1307_v10 = vld [vmem:[%s4339_s30] sm:$0xff] }
  0x97   : > { %2467 = vmatmul.msk.bf16.gmra.mxu0 %vm701_vm3, %v2650_v18  ;;  %578 = vperm.xlu2 %2824, %v508_v19   ;;  %v1310_v18 = vld [vmem:[%s4340_s7 + $0x18] sm:$0xff]  ;;  %v1309_v19 = vld [vmem:[%s4340_s7 + $0x10] sm:$0xff] }
  0x98   : > { %573 = vperm.xlu1 %2823, %v507_v20   ;;  %588 = vperm.xlu0 %2822, %v510_v21   ;;  %v1308_v20 = vld [vmem:[%s4340_s7 + $0x8] sm:$0xff] }
  0x9f   : > { %553 = vperm.xlu2 %2824, %v503_v22  }
  0xa0   : > { %568 = vperm.xlu1 %2823, %v506_v23   ;;  %563 = vperm.xlu0 %2822, %v505_v24  }
  0xa7   : > { %2468 = vmatmul.msk.bf16.gmra.mxu0 %vm701_vm3, %v2651_v25  ;;  %633 = vperm.xlu2 %2824, %v519_v26   ;;  %v1313_v26 = vld [vmem:[%s4340_s7 + $0x30] sm:$0xff] }
  0xa8   : > { %603 = vperm.xlu1 %2823, %v513_v27   ;;  %558 = vperm.xlu0 %2822, %v504_v28   ;;  %v1312_v28 = vld [vmem:[%s4340_s7 + $0x28] sm:$0xff] }
  0xaf   : > { %628 = vperm.xlu2 %2824, %v518_v29   ;;  %v1311_v29 = vld [vmem:[%s4340_s7 + $0x20] sm:$0xff] }
  0xb0   : > { %623 = vperm.xlu1 %2823, %v517_v30   ;;  %638 = vperm.xlu0 %2822, %v520_v31  }
  0xb7   : > { %2469 = vmatmul.msk.bf16.gmra.mxu0 %vm701_vm3, %v2652_v32  ;;  %608 = vperm.xlu2 %2824, %v514_v33   ;;  %v2659_v33 = vld [vmem:[%s4337_s27 + $0x50] sm:$0xff] }
  0xb8   : > { %618 = vperm.xlu1 %2823, %v516_v34   ;;  %613 = vperm.xlu0 %2822, %v515_v35   ;;  %v1319_v35 = vld [vmem:[%s4340_s7 + $0x60] sm:$0xff] }
  0xbf   : > { %926 = vperm.xlu2 %2824, %v884_v36  }
  0xc0   : > { %921 = vperm.xlu1 %2823, %v883_v37   ;;  %916 = vperm.xlu0 %2822, %v882_v38   ;;  %v1322_v37 = vld [vmem:[%s4340_s7 + $0x78] sm:$0xff]  ;;  %v1321_v38 = vld [vmem:[%s4340_s7 + $0x70] sm:$0xff] }
  0xc7   : > { %2470 = vmatmul.msk.bf16.gmra.mxu0 %vm701_vm3, %v2653_v39  ;;  %941 = vperm.xlu2 %2824, %v887_v40  }
  0xc8   : > { %936 = vperm.xlu1 %2823, %v886_v41   ;;  %931 = vperm.xlu0 %2822, %v885_v42  }
  0xcf   : > { %956 = vperm.xlu2 %2824, %v890_v43   ;;  %v1318_v43 = vld [vmem:[%s4340_s7 + $0x58] sm:$0xff] }
  0xd0   : > { %951 = vperm.xlu1 %2823, %v889_v44   ;;  %946 = vperm.xlu0 %2822, %v888_v45   ;;  %v1317_v44 = vld [vmem:[%s4340_s7 + $0x50] sm:$0xff]  ;;  %v1320_v45 = vld [vmem:[%s4340_s7 + $0x68] sm:$0xff] }
  0xd7   : > { %2471 = vmatmul.msk.bf16.gmra.mxu0 %vm701_vm3, %v2654_v46  ;;  %971 = vperm.xlu2 %2824, %v893_v47  }
  0xd8   : > { %966 = vperm.xlu1 %2823, %v892_v48   ;;  %961 = vperm.xlu0 %2822, %v891_v49  }
  0xd9   : > { %v544_v13 = vpop.permute.xlu2 %543 }
  0xdf   : > { %986 = vperm.xlu2 %2824, %v896_v50  }
  0xe0   : > { %981 = vperm.xlu1 %2823, %v895_v51   ;;  %976 = vperm.xlu0 %2822, %v894_v52   ;;  %v2660_v51 = vld [vmem:[%s4337_s27 + $0x58] sm:$0xff] }
  0xe1   : > { %v549_v21 = vpop.permute.xlu2 %548 }
  0xe7   : > { %2472 = vmatmul.msk.bf16.gmra.mxu0 %vm701_vm3, %v2655_v53  ;;  %1001 = vperm.xlu2 %2824, %v899_v54   ;;  %v1314_v53 = vld [vmem:[%s4340_s7 + $0x38] sm:$0xff]  ;;  %v1316_v54 = vld [vmem:[%s4340_s7 + $0x48] sm:$0xff] }
  0xe8   : > { %996 = vperm.xlu1 %2823, %v898_v55   ;;  %991 = vperm.xlu0 %2822, %v897_v56   ;;  %v1315_v55 = vld [vmem:[%s4340_s7 + $0x40] sm:$0xff] }
  0xe9   : > { %v3609_v36 = vpop.permute.xlu2 %583 }
  0xef   : > { %1016 = vperm.xlu2 %2824, %v902_v57  }
  0xf0   : > { %1011 = vperm.xlu1 %2823, %v901_v58   ;;  %1006 = vperm.xlu0 %2822, %v900_v59  }
  0xf1   : > { %v3629_v48 = vpop.permute.xlu2 %578 }
  0xf2   : > { %v3562_v8 = vpop.permute.xlu0 %523  ;;  %v534_v14 = vpop.permute.xlu1 %533 }
  0xf7   : > { %2473 = vmatmul.msk.bf16.gmra.mxu0 %vm701_vm3, %v2656_v60  ;;  %1031 = vperm.xlu2 %2824, %v905_v61   ;;  %v1575_v61 = vld [vmem:[%s4341_s12 + $0x10] sm:$0xff] }
  0xf8   : > { %1026 = vperm.xlu1 %2823, %v904_v62   ;;  %1021 = vperm.xlu0 %2822, %v903_v63   ;;  %v1574_v62 = vld [vmem:[%s4342_s18 + $0x8] sm:$0xff]  ;;  %v1573_v63 = vld [vmem:[%s4342_s18] sm:$0xff] }
  0xf9   : > { %v554_v56 = vpop.permute.xlu2 %553 }
  0xfa   : > { %v3578_v16 = vpop.permute.xlu0 %528  ;;  %v539_v23 = vpop.permute.xlu1 %538 }
  0xff   : > { %1046 = vperm.xlu2 %2824, %v908_v0  }
 0x100   : > { %1041 = vperm.xlu1 %2823, %v907_v1   ;;  %1036 = vperm.xlu0 %2822, %v906_v2  }
 0x102   : > { %v3593_v27 = vpop.permute.xlu0 %593 }
 0x104   : > { %v3550_v4 = vpop.f32.mrf.mxu0 }
 0x107   : > { %2474 = vmatmul.msk.bf16.gmra.mxu0 %vm701_vm3, %v2657_v3  ;;  %1061 = vperm.xlu2 %2824, %v911_v5   ;;  %v1578_v5 = vld [vmem:[%s4342_s18 + $0x28] sm:$0xff] }
 0x108   : > { %1056 = vperm.xlu1 %2823, %v910_v6   ;;  %1051 = vperm.xlu0 %2822, %v909_v7   ;;  %v1577_v6 = vld [vmem:[%s4342_s18 + $0x20] sm:$0xff]  ;;  %v1576_v7 = vld [vmem:[%s4342_s18 + $0x18] sm:$0xff] }
 0x10a   : > { %v3618_v39 = vpop.permute.xlu0 %588 }
 0x10c   : > { %v3564_v9 = vpop.f32.mrf.mxu0 }
 0x10f   : > { %1325 = vperm.xlu2 %2824, %v1307_v10  }
 0x110   : > { %1071 = vperm.xlu1 %2823, %v913_v11   ;;  %1066 = vperm.xlu0 %2822, %v912_v12   ;;  %v1581_v11 = vld [vmem:[%s4342_s18 + $0x40] sm:$0xff]  ;;  %v1580_v12 = vld [vmem:[%s4342_s18 + $0x38] sm:$0xff] }
 0x112   : > { %v3633_v50 = vpop.permute.xlu0 %563 }
 0x114   : > { %v759_v17 = vpop.f32.mrf.mxu0 }
 0x115   : > { %v760_v22 = vadd.f32 %v759_v17, %v534_v14  ;;  %v1583_v17 = vld [vmem:[%s4342_s18 + $0x50] sm:$0xff] }
 0x117   : > { %2475 = vmatmul.msk.bf16.gmra.mxu0 %vm701_vm3, %v2658_v15  ;;  %1340 = vperm.xlu2 %2824, %v1310_v18   ;;  %v816_v30 = vmax.f32 %v760_v22, 0.0  ;;  %v1584_v15 = vld [vmem:[%s4342_s18 + $0x58] sm:$0xff]  ;;  %v1582_v18 = vld [vmem:[%s4342_s18 + $0x48] sm:$0xff] }
 0x118   : > { %1335 = vperm.xlu1 %2823, %v1309_v19   ;;  %1330 = vperm.xlu0 %2822, %v1308_v20   ;;  %v599_v19 = vpop.permute.xlu1 %598  ;;  %v1586_v22 = vld [vmem:[%s4342_s18 + $0x68] sm:$0xff] }
 0x11a   : > { %v559_v58 = vpop.permute.xlu0 %558 }
 0x11c   : > { %v761_v24 = vpop.f32.mrf.mxu0 }
 0x11d   : > { %v762_v25 = vadd.f32 %v761_v24, %v539_v23  ;;  %v1585_v23 = vld [vmem:[%s4342_s18 + $0x60] sm:$0xff] }
 0x11f   : > { %v817_v31 = vmax.f32 %v762_v25, 0.0  ;;  %1355 = vperm.xlu2 %2824, %v1313_v26   ;;  %v1590_v25 = vld [vmem:[%s4342_s18 + $0x88] sm:$0xff] }
 0x120   : > { %1350 = vperm.xlu1 %2823, %v1312_v28   ;;  %1345 = vperm.xlu0 %2822, %v1311_v29   ;;  %v574_v26 = vpop.permute.xlu1 %573  ;;  %v1589_v28 = vld [vmem:[%s4342_s18 + $0x80] sm:$0xff]  ;;  %v1588_v29 = vld [vmem:[%s4342_s18 + $0x78] sm:$0xff] }
 0x121   : > { %v3601_v32 = vpack.c.bf16 %v817_v31, %v816_v30  ;;  %v1593_v31 = vld [vmem:[%s4342_s18 + $0xa0] sm:$0xff] }
 0x124   : > { %v764_v34 = vpop.f32.mrf.mxu0 }
 0x125   : > { %v765_v40 = vadd.f32 %v764_v34, %v544_v13  ;;  %v1579_v13 = vld [vmem:[%s4342_s18 + $0x30] sm:$0xff] }
 0x126   : > { %v1591_v34 = vld [vmem:[%s4342_s18 + $0x90] sm:$0xff] }
 0x127   : > { %2476 = vmatmul.msk.bf16.gmra.mxu0 %vm701_vm3, %v2659_v33  ;;  %1385 = vperm.xlu2 %2824, %v1319_v35   ;;  %v818_v46 = vmax.f32 %v765_v40, 0.0  ;;  %v1592_v33 = vld [vmem:[%s4342_s18 + $0x98] sm:$0xff]  ;;  %v1595_v40 = vld [vmem:[%s4342_s18 + $0xb0] sm:$0xff] }
 0x128   : > { %1400 = vperm.xlu1 %2823, %v1322_v37   ;;  %1395 = vperm.xlu0 %2822, %v1321_v38   ;;  %v569_v35 = vpop.permute.xlu1 %568  ;;  %v1596_v38 = vld [vmem:[%s4342_s18 + $0xb8] sm:$0xff] }
 0x12c   : > { %v766_v41 = vpop.f32.mrf.mxu0 }
 0x12d   : > { %v767_v42 = vadd.f32 %v766_v41, %v549_v21  ;;  %v1587_v21 = vld [vmem:[%s4342_s18 + $0x70] sm:$0xff]  ;;  %v1594_v41 = vld [vmem:[%s4342_s18 + $0xa8] sm:$0xff] }
 0x12f   : > { %v819_v47 = vmax.f32 %v767_v42, 0.0  ;;  %1380 = vperm.xlu2 %2824, %v1318_v43   ;;  %v3726_v42 = vpop.permute.xlu2 %633 }
 0x130   : > { %1375 = vperm.xlu1 %2823, %v1317_v44   ;;  %1390 = vperm.xlu0 %2822, %v1320_v45   ;;  %v3728_v43 = vpop.permute.xlu1 %603 }
 0x131   : > { %v3631_v49 = vpack.c.bf16 %v819_v47, %v818_v46  ;;  %v3731_v46 = vpop.permute.xlu0 %638 }
 0x134   : > { %v769_v52 = vpop.f32.mrf.mxu0 }
 0x135   : > { %v770_v57 = vadd.f32 %v769_v52, %v554_v56  ;;  %v1599_v52 = vld [vmem:[%s4342_s18 + $0xd0] sm:$0xff] }
 0x137   : > { %2477 = vmatmul.msk.bf16.gmra.mxu0 %vm701_vm3, %v2660_v51  ;;  %1360 = vperm.xlu2 %2824, %v1314_v53   ;;  %v820_v0 = vmax.f32 %v770_v57, 0.0  ;;  %v1598_v53 = vld [vmem:[%s4342_s18 + $0xc8] sm:$0xff]  ;;  %v3744_v57 = vpop.permute.xlu2 %628 }
 0x138   : > { %1370 = vperm.xlu1 %2823, %v1316_v54   ;;  %1365 = vperm.xlu0 %2822, %v1315_v55   ;;  %v1597_v54 = vld [vmem:[%s4342_s18 + $0xc0] sm:$0xff] }
 0x13c   : > { %v771_v59 = vpop.f32.mrf.mxu0 }
 0x13d   : > { %v772_v60 = vadd.f32 %v771_v59, %v559_v58 }
 0x13f   : > { %v821_v1 = vmax.f32 %v772_v60, 0.0  ;;  %1617 = vperm.xlu2 %2824, %v1575_v61  }
 0x140   : > { %1612 = vperm.xlu1 %2823, %v1574_v62   ;;  %1607 = vperm.xlu0 %2822, %v1573_v63   ;;  %v3747_v62 = vpop.permute.xlu1 %623 }
 0x141   : > { %v3657_v2 = vpack.c.bf16 %v821_v1, %v820_v0 }
 0x144   : > { %v3659_v3 = vpop.f32.mrf.mxu0 }
 0x147   : > { %1632 = vperm.xlu2 %2824, %v1578_v5   ;;  %v1601_v5 = vld [vmem:[%s4342_s18 + $0xe0] sm:$0xff] }
 0x148   : > { %1627 = vperm.xlu1 %2823, %v1577_v6   ;;  %1622 = vperm.xlu0 %2822, %v1576_v7   ;;  %v1600_v6 = vld [vmem:[%s4342_s18 + $0xd8] sm:$0xff]  ;;  %v3761_v7 = vpop.permute.xlu0 %613 }
 0x14c   : > { %v3670_v10 = vpop.f32.mrf.mxu0 }
 0x14f   : > { %1647 = vperm.xlu2 %2824, %v1581_v11   ;;  %v775_v11 = vadd.f32 %v3659_v3, %v3633_v50  ;;  %v1604_v50 = vld [vmem:[%s4342_s18 + $0xf8] sm:$0xff]  ;;  %v1603_v3 = vld [vmem:[%s4342_s18 + $0xf0] sm:$0xff] }
 0x150   : > { %1642 = vperm.xlu1 %2823, %v1580_v12   ;;  %1637 = vperm.xlu0 %2822, %v1579_v13  }
 0x154   : > { %v779_v14 = vpop.f32.mrf.mxu0 }
 0x155   : > { %v780_v60 = vadd.f32 %v779_v14, %v574_v26  ;;  %v3765_v14 = vpop.permute.xlu2 %608 }
 0x157   : > { %1662 = vperm.xlu2 %2824, %v1584_v15   ;;  %v822_v15 = vmax.f32 %v775_v11, 0.0 }
 0x158   : > { %1657 = vperm.xlu1 %2823, %v1583_v17   ;;  %1652 = vperm.xlu0 %2822, %v1582_v18  }
 0x15c   : > { %v781_v20 = vpop.f32.mrf.mxu0 }
 0x15f   : > { %1677 = vperm.xlu2 %2824, %v1587_v21  }
 0x160   : > { %1672 = vperm.xlu1 %2823, %v1586_v22   ;;  %1667 = vperm.xlu0 %2822, %v1585_v23   ;;  %v757_v22 = vadd.f32 %v3564_v9, %v3578_v16  ;;  %v3781_v23 = vpop.permute.xlu2 %926 }
 0x162   : > { %v815_v26 = vmax.f32 %v757_v22, 0.0 }
 0x164   : > { %v784_v24 = vpop.f32.mrf.mxu0 }
 0x167   : > { %1692 = vperm.xlu2 %2824, %v1590_v25  }
 0x168   : > { %1687 = vperm.xlu1 %2823, %v1589_v28   ;;  %1682 = vperm.xlu0 %2822, %v1588_v29  }
 0x16c   : > { %v786_v30 = vpop.f32.mrf.mxu0 }
 0x16d   : > { %v787_v47 = vadd.f32 %v786_v30, %v3618_v39  ;;  %v782_v39 = vadd.f32 %v781_v20, %v3629_v48  ;;  %v1602_v48 = vld [vmem:[%s4342_s18 + $0xe8] sm:$0xff]  ;;  %v3775_v20 = vpop.permute.xlu0 %916  ;;  %v2674_v30 = vld [vmem:[#allocation4 + $0x68] sm:$0xff] }
 0x16f   : > { %1707 = vperm.xlu2 %2824, %v1593_v31   ;;  %v827_v58 = vmax.f32 %v787_v47, 0.0  ;;  %v825_v0 = vmax.f32 %v782_v39, 0.0  ;;  %v3793_v31 = vpop.permute.xlu2 %941 }
 0x170   : > { %1702 = vperm.xlu1 %2823, %v1592_v33   ;;  %1697 = vperm.xlu0 %2822, %v1591_v34  }
 0x174   : > { %v789_v37 = vpop.f32.mrf.mxu0 }
 0x175   : > { %v790_v44 = vadd.f32 %v789_v37, %v3593_v27  ;;  %v785_v27 = vadd.f32 %v784_v24, %v3609_v36  ;;  %v777_v36 = vadd.f32 %v3670_v10, %v569_v35  ;;  %v824_v10 = vmax.f32 %v780_v60, 0.0  ;;  %v3789_v29 = vpop.permute.xlu0 %931  ;;  %v2662_v35 = vld [vmem:[#allocation4 + $0x8] sm:$0xff]  ;;  %v2675_v37 = vld [vmem:[#allocation4 + $0x70] sm:$0xff] }
 0x176   : > { %v755_v24 = vadd.f32 %v3550_v4, %v3562_v8 }
 0x177   : > { %1722 = vperm.xlu2 %2824, %v1596_v38   ;;  %v828_v55 = vmax.f32 %v790_v44, 0.0  ;;  %v826_v61 = vmax.f32 %v785_v27, 0.0  ;;  %v823_v12 = vmax.f32 %v777_v36, 0.0  ;;  %v843_v13 = vpack.c.bf16 %v825_v0, %v824_v10  ;;  %v3799_v33 = vpop.permute.xlu2 %956  ;;  %v2663_v27 = vld [vmem:[#allocation4 + $0x10] sm:$0xff] }
 0x178   : > { %1717 = vperm.xlu1 %2823, %v1595_v40   ;;  %1712 = vperm.xlu0 %2822, %v1594_v41   ;;  %v814_v28 = vmax.f32 %v755_v24, 0.0 }
 0x179   : > { %v844_v1 = vpack.c.bf16 %v827_v58, %v826_v61  ;;  %v842_v18 = vpack.c.bf16 %v823_v12, %v822_v15 }
 0x17a   : > { %v838_v16 = vpack.c.bf16 %v815_v26, %v814_v28 }
 0x17c   : > { %v791_v45 = vpop.f32.mrf.mxu0 }
 0x17d   : > { %v792_v51 = vadd.f32 %v791_v45, %v599_v19  ;;  %v619_v19 = vpop.permute.xlu1 %618 }
 0x17f   : > { %v829_v56 = vmax.f32 %v792_v51, 0.0  ;;  %1737 = vperm.xlu2 %2824, %v1599_v52   ;;  %v3805_v40 = vpop.permute.xlu2 %971 }
 0x180   : > { %1732 = vperm.xlu1 %2823, %v1598_v53   ;;  %1727 = vperm.xlu0 %2822, %v1597_v54  }
 0x181   : > { %v845_v59 = vpack.c.bf16 %v829_v56, %v828_v55  ;;  %v2676_v55 = vld [vmem:[#allocation4 + $0x78] sm:$0xff] }
 0x183   : > { %1170 = vmatpush.bf16.msra.mxu1 %v845_v59  ;;  %2701 = vmatpush.bf16.msra.mxu2 %v845_v59 }
 0x184   : > { %v3749_v63 = vpop.f32.mrf.mxu0 }
 0x185   : > { %v3787_v25 = vpop.permute.xlu1 %921 }
 0x187   : > { %1171 = vmatpush.bf16.msra.mxu1 %v844_v1  ;;  %2702 = vmatpush.bf16.msra.mxu2 %v844_v1  ;;  %v3812_v52 = vpop.permute.xlu2 %986 }
 0x188   : > { %1752 = vperm.xlu2 %2824, %v1602_v48   ;;  %1747 = vperm.xlu1 %2823, %v1601_v5   ;;  %v795_v5 = vadd.f32 %v3749_v63, %v3728_v43 }
 0x189   : > { %1742 = vperm.xlu0 %2822, %v1600_v6  }
 0x18b   : > { %1172 = vmatpush.bf16.msra.mxu1 %v843_v13  ;;  %2703 = vmatpush.bf16.msra.mxu2 %v843_v13  ;;  %v830_v13 = vmax.f32 %v795_v5, 0.0 }
 0x18c   : > { %v3767_v17 = vpop.f32.mrf.mxu0 }
 0x18d   : > { %v3795_v4 = vpop.permute.xlu1 %936 }
 0x18f   : > { %1173 = vmatpush.bf16.msra.mxu1 %v842_v18  ;;  %2704 = vmatpush.bf16.msra.mxu2 %v842_v18  ;;  %v3824_v48 = vpop.permute.xlu2 %1001  ;;  %v2664_v18 = vld [vmem:[#allocation4 + $0x18] sm:$0xff] }
 0x190   : > { %1762 = vperm.xlu1 %2823, %v1604_v50  }
 0x191   : > { %1757 = vperm.xlu0 %2822, %v1603_v3   ;;  %v2665_v3 = vld [vmem:[#allocation4 + $0x20] sm:$0xff] }
 0x193   : > { %1174 = vmatpush.bf16.msra.mxu1 %v3657_v2  ;;  %2705 = vmatpush.bf16.msra.mxu2 %v3657_v2  ;;  %v2661_v2 = vld [vmem:[#allocation4] sm:$0xff] }
 0x194   : > { %v799_v21 = vpop.f32.mrf.mxu0 }
 0x195   : > { %v3801_v34 = vpop.permute.xlu1 %951  ;;  %v800_v0 = vadd.f32 %v799_v21, %v3761_v7  ;;  %v2678_v21 = vld [vmem:[%s4343_s1 + $0x8] sm:$0xff] }
 0x197   : > { %1175 = vmatpush.bf16.msra.mxu1 %v3631_v49  ;;  %2706 = vmatpush.bf16.msra.mxu2 %v3631_v49  ;;  %v3797_v49 = vpop.permute.xlu0 %946  ;;  %v832_v6 = vmax.f32 %v800_v0, 0.0  ;;  %v2669_v0 = vld [vmem:[#allocation4 + $0x40] sm:$0xff] }
 0x19b   : > { %1176 = vmatpush.bf16.msra.mxu1 %v3601_v32  ;;  %2707 = vmatpush.bf16.msra.mxu2 %v3601_v32 }
 0x19c   : > { %v801_v9 = vpop.f32.mrf.mxu0 }
 0x19d   : > { %v3807_v44 = vpop.permute.xlu1 %966  ;;  %v802_v60 = vadd.f32 %v801_v9, %v619_v19  ;;  %v2666_v9 = vld [vmem:[#allocation4 + $0x28] sm:$0xff] }
 0x19f   : > { %1177 = vmatpush.bf16.msra.mxu1 %v838_v16  ;;  %2708 = vmatpush.bf16.msra.mxu2 %v838_v16  ;;  %v3803_v38 = vpop.permute.xlu0 %961  ;;  %v833_v1 = vmax.f32 %v802_v60, 0.0  ;;  %v2679_v16 = vld [vmem:[%s4343_s1 + $0x10] sm:$0xff] }
 0x1a1   : > { %v847_v10 = vpack.c.bf16 %v833_v1, %v832_v6 }
 0x1a2   : > { %1178 = vmatmul.bf16.vlgmr.msra.gmra.mxu1 %v2661_v2  ;;  %1243 = vmatmul.bf16.vlgmr.msra.gmra.mxu2 %v2674_v30 }
 0x1a4   : > { %v804_v8 = vpop.f32.mrf.mxu0 }
 0x1a5   : > { %v805_v56 = vadd.f32 %v804_v8, %v3747_v62  ;;  %v3817_v59 = vpop.permute.xlu1 %981 }
 0x1a7   : > { %v3809_v45 = vpop.permute.xlu0 %976 }
 0x1ac   : > { %v806_v32 = vpop.f32.mrf.mxu0 }
 0x1ad   : > { %v807_v53 = vadd.f32 %v806_v32, %v3744_v57  ;;  %v834_v57 = vmax.f32 %v805_v56, 0.0  ;;  %v3828_v12 = vpop.permute.xlu1 %996  ;;  %v2681_v56 = vld [vmem:[%s4343_s1 + $0x20] sm:$0xff] }
 0x1af   : > { %v835_v61 = vmax.f32 %v807_v53, 0.0 }
 0x1b1   : > { %v848_v62 = vpack.c.bf16 %v835_v61, %v834_v57  ;;  %v2682_v57 = vld [vmem:[%s4343_s1 + $0x28] sm:$0xff] }
 0x1b2   : > { %1183 = vmatmul.bf16.gmra.mxu1 %v2662_v35  ;;  %1248 = vmatmul.bf16.gmra.mxu2 %v2675_v37  ;;  %v2667_v37 = vld [vmem:[#allocation4 + $0x30] sm:$0xff] }
 0x1b4   : > { %v809_v41 = vpop.f32.mrf.mxu0 }
 0x1b5   : > { %v810_v47 = vadd.f32 %v809_v41, %v3726_v42  ;;  %v3819_v42 = vpop.permute.xlu0 %991  ;;  %v3838_v43 = vpop.permute.xlu1 %1011  ;;  %v2680_v41 = vld [vmem:[%s4343_s1 + $0x18] sm:$0xff] }
 0x1b7   : > { %v836_v39 = vmax.f32 %v810_v47, 0.0 }
 0x1bc   : > { %v811_v51 = vpop.f32.mrf.mxu0 }
 0x1bd   : > { %v812_v54 = vadd.f32 %v811_v51, %v3731_v46  ;;  %v797_v46 = vadd.f32 %v3767_v17, %v3765_v14  ;;  %v3830_v7 = vpop.permute.xlu0 %1006  ;;  %v2677_v14 = vld [vmem:[%s4343_s1] sm:$0xff]  ;;  %v3835_v17 = vpop.permute.xlu2 %1016 }
 0x1be   : > { %v3844_v50 = vpop.permute.xlu1 %1026 }
 0x1bf   : > { %v837_v58 = vmax.f32 %v812_v54, 0.0  ;;  %v831_v11 = vmax.f32 %v797_v46, 0.0 }
 0x1c1   : > { %v849_v36 = vpack.c.bf16 %v837_v58, %v836_v39  ;;  %v846_v15 = vpack.c.bf16 %v831_v11, %v830_v13 }
 0x1c2   : > { %1188 = vmatmul.bf16.gmra.mxu1 %v2663_v27  ;;  %1253 = vmatmul.bf16.gmra.mxu2 %v2676_v55  ;;  %v2668_v55 = vld [vmem:[#allocation4 + $0x38] sm:$0xff] }
 0x1c3   : > { %1472 = vmatpush.bf16.msrb.mxu2 %v849_v36 }
 0x1c5   : > { %v3840_v63 = vpop.permute.xlu0 %1021  ;;  %v3842_v19 = vpop.permute.xlu2 %1031 }
 0x1c6   : > { %v3852_v26 = vpop.permute.xlu1 %1041 }
 0x1c7   : > { %1473 = vmatpush.bf16.msrb.mxu2 %v848_v62 }
 0x1cb   : > { %1474 = vmatpush.bf16.msrb.mxu2 %v847_v10 }
 0x1cd   : > { %v3849_v22 = vpop.permute.xlu0 %1036  ;;  %v1047_v24 = vpop.permute.xlu2 %1046 }
 0x1ce   : > { %v1057_v30 = vpop.permute.xlu1 %1056 }
 0x1cf   : > { %1475 = vmatpush.bf16.msrb.mxu2 %v846_v15 }
 0x1d2   : > { %1193 = vmatmul.bf16.gmra.mxu1 %v2664_v18  ;;  %2574 = vmatmul.msk.bf16.vlgmr.msrb.gmra.mxu2 %vm1443_vm4, %v2677_v14 }
 0x1d5   : > { %v1052_v28 = vpop.permute.xlu0 %1051  ;;  %v3857_v2 = vpop.permute.xlu2 %1061 }
 0x1d6   : > { %v3864_v35 = vpop.permute.xlu1 %1071 }
 0x1dd   : > { %v3860_v8 = vpop.permute.xlu0 %1066  ;;  %v3862_v32 = vpop.permute.xlu2 %1325 }
 0x1de   : > { %v3874_v53 = vpop.permute.xlu1 %1335 }
 0x1e2   : > { %1198 = vmatmul.bf16.gmra.mxu1 %v2665_v3  ;;  %2575 = vmatmul.msk.bf16.gmra.mxu2 %vm1443_vm4, %v2678_v21 }
 0x1e5   : > { %v3869_v47 = vpop.permute.xlu0 %1330  ;;  %v3872_v51 = vpop.permute.xlu2 %1340 }
 0x1e6   : > { %v3883_v39 = vpop.permute.xlu1 %1350 }
 0x1ed   : > { %v3876_v54 = vpop.permute.xlu0 %1345  ;;  %v3878_v27 = vpop.permute.xlu2 %1355 }
 0x1ee   : > { %v3890_v61 = vpop.permute.xlu1 %1400 }
 0x1f2   : > { %1203 = vmatmul.bf16.gmra.mxu1 %v2666_v9  ;;  %2576 = vmatmul.msk.bf16.gmra.mxu2 %vm1443_vm4, %v2679_v16  ;;  %v2683_v16 = vld [vmem:[%s4343_s1 + $0x30] sm:$0xff] }
 0x1f5   : > { %v3886_v58 = vpop.permute.xlu0 %1395  ;;  %v3888_v60 = vpop.permute.xlu2 %1385 }
 0x1f6   : > { %v3901_v6 = vpop.permute.xlu1 %1375 }
 0x1fd   : > { %v3892_v36 = vpop.permute.xlu0 %1390  ;;  %v3898_v62 = vpop.permute.xlu2 %1380 }
 0x1fe   : > { %v3908_v21 = vpop.permute.xlu1 %1370 }
 0x202   : > { %1208 = vmatmul.bf16.gmra.mxu1 %v2667_v37  ;;  %2577 = vmatmul.msk.bf16.gmra.mxu2 %vm1443_vm4, %v2680_v41  ;;  %v2670_v41 = vld [vmem:[#allocation4 + $0x48] sm:$0xff] }
 0x205   : > { %v3903_v13 = vpop.permute.xlu0 %1365  ;;  %v3905_v14 = vpop.permute.xlu2 %1360 }
 0x212   : > { %1213 = vmatmul.bf16.gmra.mxu1 %v2668_v55  ;;  %2578 = vmatmul.msk.bf16.gmra.mxu2 %vm1443_vm4, %v2681_v56  ;;  %v3913_v55 = vpop.permute.xlu0 %1607 }
 0x21f   : > { %v1179_v46 = vpop.f32.mrf.mxu1 }
 0x220   : > { %v1180_v1 = vadd.f32 %v1179_v46, %v3775_v20 }
 0x222   : > { %v1259_v5 = vmax.f32 %v1180_v1, 0.0  ;;  %1218 = vmatmul.bf16.gmra.mxu1 %v2669_v0  ;;  %2579 = vmatmul.msk.bf16.gmra.mxu2 %vm1443_vm4, %v2682_v57  ;;  %v3917_v0 = vpop.permute.xlu2 %1617  ;;  %v3919_v1 = vpop.permute.xlu1 %1612 }
 0x224   : > { %1982 = vmax.xlane.f32.xlu2 %v1259_v5 }
 0x225   : > { %v1244_v11 = vpop.f32.mrf.mxu2 }
 0x226   : > { %v1245_v10 = vadd.f32 %v1244_v11, %v1047_v24 }
 0x227   : > { %v1181_v15 = vpop.f32.mrf.mxu1 }
 0x228   : > { %v1285_v18 = vmax.f32 %v1245_v10, 0.0  ;;  %v1182_v20 = vadd.f32 %v1181_v15, %v3787_v25  ;;  %v3921_v10 = vpop.permute.xlu0 %1622 }
 0x22a   : > { %2034 = vmax.xlane.f32.xlu0 %v1285_v18  ;;  %v1260_v56 = vmax.f32 %v1182_v20, 0.0 }
 0x22d   : > { %v1246_v3 = vpop.f32.mrf.mxu2 }
 0x22e   : > { %v1247_v9 = vadd.f32 %v1246_v3, %v1052_v28  ;;  %v3928_v3 = vpop.permute.xlu2 %1632 }
 0x22f   : > { %v1184_v37 = vpop.f32.mrf.mxu1 }
 0x230   : > { %v1286_v24 = vmax.f32 %v1247_v9, 0.0  ;;  %v1185_v25 = vadd.f32 %v1184_v37, %v3781_v23  ;;  %v2684_v23 = vld [vmem:[%s4343_s1 + $0x38] sm:$0xff] }
 0x231   : > { %v2671_v9 = vld [vmem:[#allocation4 + $0x50] sm:$0xff] }
 0x232   : > { %2580 = vmatmul.msk.bf16.gmra.mxu2 %vm1443_vm4, %v2683_v16  ;;  %2036 = vmax.xlane.f32.xlu1 %v1286_v24  ;;  %v1261_v5 = vmax.f32 %v1185_v25, 0.0 }
 0x233   : > { %1223 = vmatmul.bf16.gmra.mxu1 %v2670_v41  ;;  %1984 = vmax.xlane.f32.xlu0 %v1260_v56  ;;  %v3930_v41 = vpop.permute.xlu1 %1627 }
 0x235   : > { %v1249_v28 = vpop.f32.mrf.mxu2 }
 0x236   : > { %v1250_v57 = vadd.f32 %v1249_v28, %v1057_v30 }
 0x237   : > { %v1186_v46 = vpop.f32.mrf.mxu1 }
 0x238   : > { %v1287_v11 = vmax.f32 %v1250_v57, 0.0  ;;  %v1187_v15 = vadd.f32 %v1186_v46, %v3789_v29  ;;  %v3933_v29 = vpop.permute.xlu0 %1637  ;;  %v3938_v46 = vpop.permute.xlu2 %1647 }
 0x23a   : > { %1986 = vmax.xlane.f32.xlu1 %v1261_v5  ;;  %2038 = vmax.xlane.f32.xlu2 %v1287_v11  ;;  %v1262_v37 = vmax.f32 %v1187_v15, 0.0 }
 0x23b   : > { %v3940_v15 = vpop.permute.xlu1 %1642 }
 0x23d   : > { %v1251_v18 = vpop.f32.mrf.mxu2 }
 0x23e   : > { %v1252_v20 = vadd.f32 %v1251_v18, %v3857_v2 }
 0x23f   : > { %v1189_v30 = vpop.f32.mrf.mxu1 }
 0x240   : > { %v1288_v16 = vmax.f32 %v1252_v20, 0.0  ;;  %v1190_v2 = vadd.f32 %v1189_v30, %v3795_v4  ;;  %v3943_v4 = vpop.permute.xlu0 %1652 }
 0x242   : > { %2581 = vmatmul.msk.bf16.gmra.mxu2 %vm1443_vm4, %v2684_v23  ;;  %2040 = vmax.xlane.f32.xlu0 %v1288_v16  ;;  %v1263_v5 = vmax.f32 %v1190_v2, 0.0  ;;  %v3946_v16 = vpop.permute.xlu2 %1662 }
 0x243   : > { %1228 = vmatmul.bf16.gmra.mxu1 %v2671_v9  ;;  %1988 = vmax.xlane.f32.xlu2 %v1262_v37  ;;  %v3948_v2 = vpop.permute.xlu1 %1657 }
 0x245   : > { %v1254_v24 = vpop.f32.mrf.mxu2 }
 0x246   : > { %v1255_v56 = vadd.f32 %v1254_v24, %v3860_v8  ;;  %v2672_v8 = vld [vmem:[#allocation4 + $0x58] sm:$0xff] }
 0x247   : > { %v1191_v25 = vpop.f32.mrf.mxu1 }
 0x248   : > { %v1289_v28 = vmax.f32 %v1255_v56, 0.0  ;;  %v1192_v57 = vadd.f32 %v1191_v25, %v3793_v31 }
 0x24a   : > { %v1264_v11 = vmax.f32 %v1192_v57, 0.0  ;;  %2042 = vmax.xlane.f32.xlu1 %v1289_v28  ;;  %v3954_v57 = vpop.permute.xlu2 %1677 }
 0x24b   : > { %1990 = vmax.xlane.f32.xlu2 %v1263_v5 }
 0x24c   : > { %1992 = vmax.xlane.f32.xlu0 %v1264_v11 }
 0x24d   : > { %v1256_v18 = vpop.f32.mrf.mxu2 }
 0x24e   : > { %v1257_v20 = vadd.f32 %v1256_v18, %v3864_v35  ;;  %v3951_v35 = vpop.permute.xlu0 %1667  ;;  %v2673_v18 = vld [vmem:[#allocation4 + $0x60] sm:$0xff] }
 0x24f   : > { %v1194_v23 = vpop.f32.mrf.mxu1 }
 0x250   : > { %v1290_v30 = vmax.f32 %v1257_v20, 0.0  ;;  %v1195_v9 = vadd.f32 %v1194_v23, %v3797_v49  ;;  %v3957_v20 = vpop.permute.xlu1 %1672 }
 0x252   : > { %v1265_v31 = vmax.f32 %v1195_v9, 0.0 }
 0x253   : > { %1233 = vmatmul.bf16.gmra.mxu1 %v2672_v8  ;;  %2044 = vmax.xlane.f32.xlu2 %v1290_v30 }
 0x254   : > { %1994 = vmax.xlane.f32.xlu1 %v1265_v31 }
 0x255   : > { %v1477_v37 = vpop.f32.mrf.mxu2 }
 0x256   : > { %v1478_v28 = vadd.f32 %v1477_v37, %v3862_v32  ;;  %v3962_v31 = vpop.permute.xlu0 %1682  ;;  %v3964_v37 = vpop.permute.xlu2 %1692 }
 0x257   : > { %v1196_v24 = vpop.f32.mrf.mxu1 }
 0x258   : > { %v1197_v56 = vadd.f32 %v1196_v24, %v3801_v34  ;;  %v1517_v23 = vmax.f32 %v1478_v28, 0.0 }
 0x25a   : > { %v1266_v25 = vmax.f32 %v1197_v56, 0.0  ;;  %v3967_v56 = vpop.permute.xlu1 %1687 }
 0x25c   : > { %1996 = vmax.xlane.f32.xlu2 %v1266_v25 }
 0x25d   : > { %v1479_v49 = vpop.f32.mrf.mxu2 }
 0x25e   : > { %v1480_v5 = vadd.f32 %v1479_v49, %v3869_v47 }
 0x25f   : > { %v1199_v11 = vpop.f32.mrf.mxu1 }
 0x260   : > { %v1518_v8 = vmax.f32 %v1480_v5, 0.0  ;;  %v1200_v30 = vadd.f32 %v1199_v11, %v3799_v33  ;;  %v3970_v33 = vpop.permute.xlu0 %1697 }
 0x262   : > { %v3960_v34 = vpack.c.bf16 %v1518_v8, %v1517_v23  ;;  %v1267_v9 = vmax.f32 %v1200_v30, 0.0  ;;  %v3974_v30 = vpop.permute.xlu2 %1707 }
 0x263   : > { %1238 = vmatmul.bf16.gmra.mxu1 %v2673_v18  ;;  %4344 = vst [vmem:[#allocation11_spill] sm:$0xff] %v3974_v30 }
 0x264   : > { %1998 = vmax.xlane.f32.xlu0 %v1267_v9 }
 0x265   : > { %v1482_v32 = vpop.f32.mrf.mxu2 }
 0x266   : > { %v1483_v28 = vadd.f32 %v1482_v32, %v3874_v53 }
 0x267   : > { %v1201_v24 = vpop.f32.mrf.mxu1 }
 0x268   : > { %v1202_v47 = vadd.f32 %v1201_v24, %v3803_v38  ;;  %v1519_v18 = vmax.f32 %v1483_v28, 0.0  ;;  %v3978_v24 = vpop.permute.xlu1 %1702  ;;  %v3980_v32 = vpop.permute.xlu0 %1712 }
 0x269   : > { %4345 = vst [vmem:[#allocation12_spill] sm:$0xff] %v3980_v32 }
 0x26a   : > { %v1268_v25 = vmax.f32 %v1202_v47, 0.0 }
 0x26c   : > { %2000 = vmax.xlane.f32.xlu1 %v1268_v25 }
 0x26d   : > { %v1484_v49 = vpop.f32.mrf.mxu2 }
 0x26e   : > { %v1485_v5 = vadd.f32 %v1484_v49, %v3872_v51  ;;  %v3983_v49 = vpop.permute.xlu2 %1722 }
 0x26f   : > { %v1204_v11 = vpop.f32.mrf.mxu1 }
 0x270   : > { %v1520_v23 = vmax.f32 %v1485_v5, 0.0  ;;  %v1205_v8 = vadd.f32 %v1204_v11, %v3807_v44  ;;  %v3986_v5 = vpop.permute.xlu1 %1717  ;;  %v3990_v32 = vpop.permute.xlu0 %1727 }
 0x272   : > { %v3976_v9 = vpack.c.bf16 %v1520_v23, %v1519_v18  ;;  %v1269_v38 = vmax.f32 %v1205_v8, 0.0 }
 0x274   : > { %2002 = vmax.xlane.f32.xlu2 %v1269_v38 }
 0x275   : > { %v1487_v53 = vpop.f32.mrf.mxu2 }
 0x276   : > { %v1488_v28 = vadd.f32 %v1487_v53, %v3876_v54 }
 0x277   : > { %v1206_v47 = vpop.f32.mrf.mxu1 }
 0x278   : > { %v1207_v25 = vadd.f32 %v1206_v47, %v3805_v40  ;;  %v1521_v23 = vmax.f32 %v1488_v28, 0.0  ;;  %v3994_v47 = vpop.permute.xlu2 %1737 }
 0x27a   : > { %v1270_v51 = vmax.f32 %v1207_v25, 0.0  ;;  %v3996_v25 = vpop.permute.xlu1 %1732 }
 0x27c   : > { %2004 = vmax.xlane.f32.xlu0 %v1270_v51 }
 0x27d   : > { %v1489_v44 = vpop.f32.mrf.mxu2 }
 0x27e   : > { %v1490_v11 = vadd.f32 %v1489_v44, %v3883_v39  ;;  %v3999_v44 = vpop.permute.xlu0 %1742 }
 0x27f   : > { %v1209_v18 = vpop.f32.mrf.mxu1  ;;  %4346 = vst [vmem:[#allocation13_spill] sm:$0xff] %v3999_v44 }
 0x280   : > { %v1522_v8 = vmax.f32 %v1490_v11, 0.0  ;;  %v1210_v38 = vadd.f32 %v1209_v18, %v3809_v45  ;;  %v4003_v18 = vpop.permute.xlu2 %1752 }
 0x281   : > { %4347 = vst [vmem:[#allocation14_spill] sm:$0xff] %v4003_v18 }
 0x282   : > { %v3992_v30 = vpack.c.bf16 %v1522_v8, %v1521_v23  ;;  %v1271_v40 = vmax.f32 %v1210_v38, 0.0 }
 0x284   : > { %2006 = vmax.xlane.f32.xlu1 %v1271_v40 }
 0x285   : > { %v1492_v54 = vpop.f32.mrf.mxu2 }
 0x286   : > { %v1493_v45 = vadd.f32 %v1492_v54, %v3878_v27  ;;  %v4010_v27 = vpop.permute.xlu0 %1757 }
 0x287   : > { %v1211_v53 = vpop.f32.mrf.mxu1  ;;  %4349 = vst [vmem:[#allocation16_spill] sm:$0xff] %v4010_v27 }
 0x288   : > { %v1212_v51 = vadd.f32 %v1211_v53, %v3817_v59  ;;  %v1523_v8 = vmax.f32 %v1493_v45, 0.0  ;;  %v4006_v59 = vpop.permute.xlu1 %1747 }
 0x289   : > { %4348 = vst [vmem:[#allocation15_spill] sm:$0xff] %v4006_v59 }
 0x28a   : > { %v1272_v39 = vmax.f32 %v1212_v51, 0.0 }
 0x28c   : > { %2008 = vmax.xlane.f32.xlu2 %v1272_v39 }
 0x28d   : > { %v1494_v28 = vpop.f32.mrf.mxu2 }
 0x28e   : > { %v1495_v11 = vadd.f32 %v1494_v28, %v3905_v14  ;;  %v2110_v14 = vld [vmem:[%s3165_s6] sm:$0xff] }
 0x28f   : > { %v1214_v23 = vpop.f32.mrf.mxu1 }
 0x290   : > { %v1524_v38 = vmax.f32 %v1495_v11, 0.0  ;;  %v1215_v40 = vadd.f32 %v1214_v23, %v3812_v52  ;;  %v2136_v23 = vld [vmem:[%s3165_s6 + $0xd0] sm:$0xff] }
 0x292   : > { %v4008_v53 = vpack.c.bf16 %v1524_v38, %v1523_v8  ;;  %v1273_v51 = vmax.f32 %v1215_v40, 0.0  ;;  %v4019_v8 = vpop.permute.xlu1 %1762 }
 0x293   : > { %4350 = vst [vmem:[#allocation17_spill] sm:$0xff] %v4019_v8 }
 0x294   : > { %2010 = vmax.xlane.f32.xlu0 %v1273_v51 }
 0x295   : > { %v4012_v54 = vpop.f32.mrf.mxu2 }
 0x297   : > { %v1216_v39 = vpop.f32.mrf.mxu1  ;;  %v1983_v45 = vpop.xlane.xlu2 %1982 }
 0x298   : > { %v1217_v28 = vadd.f32 %v1216_v39, %v3819_v42  ;;  %v2174_v52 = vmax.f32 %v2110_v14, %v1983_v45  ;;  %v2137_v39 = vld [vmem:[%s3165_s6 + $0xd8] sm:$0xff]  ;;  %v2111_v45 = vld [vmem:[%s3165_s6 + $0x8] sm:$0xff] }
 0x29a   : > { %v1274_v11 = vmax.f32 %v1217_v28, 0.0  ;;  %2239 = vst.msk [vmem:[%s3165_s6] sm:$0xff] %vm2238_vm5, %v2174_v52 }
 0x29c   : > { %2012 = vmax.xlane.f32.xlu1 %v1274_v11 }
 0x29d   : > { %v4021_v38 = vpop.f32.mrf.mxu2  ;;  %v2035_v40 = vpop.xlane.xlu0 %2034 }
 0x29e   : > { %v2200_v51 = vmax.f32 %v2136_v23, %v2035_v40 }
 0x29f   : > { %v1219_v27 = vpop.f32.mrf.mxu1 }
 0x2a0   : > { %2265 = vst.msk [vmem:[%s3165_s6 + $0xd0] sm:$0xff] %vm2238_vm5, %v2200_v51  ;;  %v1220_v42 = vadd.f32 %v1219_v27, %v3828_v12  ;;  %v2112_v27 = vld [vmem:[%s3165_s6 + $0x10] sm:$0xff]  ;;  %v2138_v51 = vld [vmem:[%s3165_s6 + $0xe0] sm:$0xff] }
 0x2a2   : > { %v1275_v14 = vmax.f32 %v1220_v42, 0.0 }
 0x2a4   : > { %2014 = vmax.xlane.f32.xlu2 %v1275_v14 }
 0x2a5   : > { %v4028_v28 = vpop.f32.mrf.mxu2  ;;  %v2037_v52 = vpop.xlane.xlu1 %2036 }
 0x2a6   : > { %v2201_v11 = vmax.f32 %v2137_v39, %v2037_v52  ;;  %v1985_v8 = vpop.xlane.xlu0 %1984 }
 0x2a7   : > { %v2175_v18 = vmax.f32 %v2111_v45, %v1985_v8  ;;  %v1221_v23 = vpop.f32.mrf.mxu1 }
 0x2a8   : > { %2266 = vst.msk [vmem:[%s3165_s6 + $0xd8] sm:$0xff] %vm2238_vm5, %v2201_v11  ;;  %v1222_v40 = vadd.f32 %v1221_v23, %v3824_v48  ;;  %v2139_v11 = vld [vmem:[%s3165_s6 + $0xe8] sm:$0xff]  ;;  %v2113_v23 = vld [vmem:[%s3165_s6 + $0x18] sm:$0xff] }
 0x2a9   : > { %2240 = vst.msk [vmem:[%s3165_s6 + $0x8] sm:$0xff] %vm2238_vm5, %v2175_v18 }
 0x2aa   : > { %v1276_v12 = vmax.f32 %v1222_v40, 0.0 }
 0x2ac   : > { %2016 = vmax.xlane.f32.xlu0 %v1276_v12 }
 0x2ad   : > { %v4037_v42 = vpop.f32.mrf.mxu2  ;;  %v1987_v14 = vpop.xlane.xlu1 %1986 }
 0x2ae   : > { %v2176_v39 = vmax.f32 %v2112_v27, %v1987_v14  ;;  %v2039_v8 = vpop.xlane.xlu2 %2038 }
 0x2af   : > { %v2202_v45 = vmax.f32 %v2138_v51, %v2039_v8 }
 0x2b0   : > { %2241 = vst.msk [vmem:[%s3165_s6 + $0x10] sm:$0xff] %vm2238_vm5, %v2176_v39  ;;  %v1224_v52 = vpop.f32.mrf.mxu1 }
 0x2b1   : > { %2267 = vst.msk [vmem:[%s3165_s6 + $0xe0] sm:$0xff] %vm2238_vm5, %v2202_v45  ;;  %v1225_v48 = vadd.f32 %v1224_v52, %v3830_v7  ;;  %v2140_v45 = vld [vmem:[%s3165_s6 + $0xf0] sm:$0xff]  ;;  %v2114_v52 = vld [vmem:[%s3165_s6 + $0x20] sm:$0xff] }
 0x2b3   : > { %v1277_v18 = vmax.f32 %v1225_v48, 0.0 }
 0x2b5   : > { %2018 = vmax.xlane.f32.xlu1 %v1277_v18  ;;  %v1507_v40 = vpop.f32.mrf.mxu2  ;;  %v2041_v12 = vpop.xlane.xlu0 %2040 }
 0x2b6   : > { %v2203_v27 = vmax.f32 %v2139_v11, %v2041_v12  ;;  %v1989_v14 = vpop.xlane.xlu2 %1988  ;;  %v2115_v11 = vld [vmem:[%s3165_s6 + $0x28] sm:$0xff] }
 0x2b7   : > { %v2177_v51 = vmax.f32 %v2113_v23, %v1989_v14 }
 0x2b8   : > { %2268 = vst.msk [vmem:[%s3165_s6 + $0xe8] sm:$0xff] %vm2238_vm5, %v2203_v27  ;;  %v1226_v39 = vpop.f32.mrf.mxu1 }
 0x2b9   : > { %2242 = vst.msk [vmem:[%s3165_s6 + $0x18] sm:$0xff] %vm2238_vm5, %v2177_v51  ;;  %v1227_v7 = vadd.f32 %v1226_v39, %v3838_v43 }
 0x2bb   : > { %v1278_v8 = vmax.f32 %v1227_v7, 0.0  ;;  %v2141_v7 = vld [vmem:[%s3165_s6 + $0xf8] sm:$0xff] }
 0x2bd   : > { %2020 = vmax.xlane.f32.xlu2 %v1278_v8  ;;  %v1509_v48 = vpop.f32.mrf.mxu2  ;;  %v2043_v18 = vpop.xlane.xlu1 %2042 }
 0x2be   : > { %v2204_v23 = vmax.f32 %v2140_v45, %v2043_v18  ;;  %v1991_v12 = vpop.xlane.xlu2 %1990  ;;  %v2116_v45 = vld [vmem:[%s3165_s6 + $0x30] sm:$0xff] }
 0x2bf   : > { %v2178_v14 = vmax.f32 %v2114_v52, %v1991_v12  ;;  %v1993_v27 = vpop.xlane.xlu0 %1992 }
 0x2c0   : > { %2269 = vst.msk [vmem:[%s3165_s6 + $0xf0] sm:$0xff] %vm2238_vm5, %v2204_v23  ;;  %v1229_v51 = vpop.f32.mrf.mxu1  ;;  %v2179_v59 = vmax.f32 %v2115_v11, %v1993_v27  ;;  %v2117_v27 = vld [vmem:[%s3165_s6 + $0x38] sm:$0xff] }
 0x2c1   : > { %2243 = vst.msk [vmem:[%s3165_s6 + $0x20] sm:$0xff] %vm2238_vm5, %v2178_v14  ;;  %v1230_v43 = vadd.f32 %v1229_v51, %v3835_v17  ;;  %v1510_v51 = vadd.f32 %v1509_v48, %v3892_v36 }
 0x2c2   : > { %2244 = vst.msk [vmem:[%s3165_s6 + $0x28] sm:$0xff] %vm2238_vm5, %v2179_v59 }
 0x2c3   : > { %v1279_v39 = vmax.f32 %v1230_v43, 0.0 }
 0x2c5   : > { %2022 = vmax.xlane.f32.xlu0 %v1279_v39  ;;  %v1512_v8 = vpop.f32.mrf.mxu2 }
 0x2c6   : > { %v2045_v52 = vpop.xlane.xlu2 %2044  ;;  %v1513_v59 = vadd.f32 %v1512_v8, %v3886_v58  ;;  %v1505_v58 = vadd.f32 %v4037_v42, %v3898_v62  ;;  %v1530_v8 = vmax.f32 %v1510_v51, 0.0 }
 0x2c7   : > { %v2205_v18 = vmax.f32 %v2141_v7, %v2045_v52  ;;  %v1995_v12 = vpop.xlane.xlu1 %1994  ;;  %v1508_v7 = vadd.f32 %v1507_v40, %v3888_v60  ;;  %v2118_v60 = vld [vmem:[%s3165_s6 + $0x40] sm:$0xff] }
 0x2c8   : > { %v1231_v23 = vpop.f32.mrf.mxu1  ;;  %v2180_v44 = vmax.f32 %v2116_v45, %v1995_v12  ;;  %v1531_v45 = vmax.f32 %v1513_v59, 0.0  ;;  %v1528_v40 = vmax.f32 %v1505_v58, 0.0  ;;  %v2685_v58 = vld [vmem:[#allocation6] sm:$0xff] }
 0x2c9   : > { %2270 = vst.msk [vmem:[%s3165_s6 + $0xf8] sm:$0xff] %vm2238_vm5, %v2205_v18  ;;  %v1232_v11 = vadd.f32 %v1231_v23, %v3840_v63  ;;  %v1529_v48 = vmax.f32 %v1508_v7, 0.0  ;;  %v1498_v23 = vadd.f32 %v4012_v54, %v3903_v13  ;;  %v2119_v13 = vld [vmem:[%s3165_s6 + $0x48] sm:$0xff]  ;;  %v2120_v7 = vld [vmem:[%s3165_s6 + $0x50] sm:$0xff] }
 0x2ca   : > { %2245 = vst.msk [vmem:[%s3165_s6 + $0x30] sm:$0xff] %vm2238_vm5, %v2180_v44 }
 0x2cb   : > { %v1280_v17 = vmax.f32 %v1232_v11, 0.0  ;;  %v1571_v62 = vpack.c.bf16 %v1530_v8, %v1529_v48 }
 0x2cd   : > { %2024 = vmax.xlane.f32.xlu1 %v1280_v17  ;;  %v1514_v14 = vpop.f32.mrf.mxu2 }
 0x2ce   : > { %v1515_v43 = vadd.f32 %v1514_v14, %v3890_v61  ;;  %v1503_v61 = vadd.f32 %v4028_v28, %v3901_v6 }
 0x2cf   : > { %v1997_v39 = vpop.xlane.xlu2 %1996 }
 0x2d0   : > { %v1532_v52 = vmax.f32 %v1515_v43, 0.0  ;;  %v1234_v63 = vpop.f32.mrf.mxu1  ;;  %v2181_v18 = vmax.f32 %v2117_v27, %v1997_v39  ;;  %v1527_v11 = vmax.f32 %v1503_v61, 0.0  ;;  %v2123_v61 = vld [vmem:[%s3165_s6 + $0x68] sm:$0xff] }
 0x2d1   : > { %v1235_v44 = vadd.f32 %v1234_v63, %v3844_v50  ;;  %v1500_v50 = vadd.f32 %v4021_v38, %v3908_v21  ;;  %v1525_v38 = vmax.f32 %v1498_v23, 0.0  ;;  %v2125_v23 = vld [vmem:[%s3165_s6 + $0x78] sm:$0xff] }
 0x2d2   : > { %v1572_v12 = vpack.c.bf16 %v1532_v52, %v1531_v45  ;;  %2246 = vst.msk [vmem:[%s3165_s6 + $0x38] sm:$0xff] %vm2238_vm5, %v2181_v18  ;;  %v1570_v14 = vpack.c.bf16 %v1528_v40, %v1527_v11  ;;  %v2124_v40 = vld [vmem:[%s3165_s6 + $0x70] sm:$0xff] }
 0x2d3   : > { %v1281_v36 = vmax.f32 %v1235_v44, 0.0  ;;  %v1526_v59 = vmax.f32 %v1500_v50, 0.0 }
 0x2d4   : > { %1861 = vmatpush.bf16.msrb.mxu0 %v1572_v12  ;;  %2709 = vmatpush.bf16.msra.mxu2 %v1572_v12 }
 0x2d5   : > { %2710 = vmatpush.bf16.msra.mxu3 %v1572_v12  ;;  %2026 = vmax.xlane.f32.xlu2 %v1281_v36  ;;  %v1569_v54 = vpack.c.bf16 %v1526_v59, %v1525_v38 }
 0x2d7   : > { %v1999_v42 = vpop.xlane.xlu0 %1998 }
 0x2d8   : > { %v1236_v17 = vpop.f32.mrf.mxu1  ;;  %v2182_v6 = vmax.f32 %v2118_v60, %v1999_v42  ;;  %1862 = vmatpush.bf16.msrb.mxu0 %v1571_v62  ;;  %2711 = vmatpush.bf16.msra.mxu2 %v1571_v62  ;;  %v2687_v60 = vld [vmem:[#allocation6 + $0x10] sm:$0xff] }
 0x2d9   : > { %v1237_v28 = vadd.f32 %v1236_v17, %v3842_v19  ;;  %2712 = vmatpush.bf16.msra.mxu3 %v1571_v62 }
 0x2da   : > { %2247 = vst.msk [vmem:[%s3165_s6 + $0x40] sm:$0xff] %vm2238_vm5, %v2182_v6  ;;  %v2690_v6 = vld [vmem:[#allocation6 + $0x28] sm:$0xff] }
 0x2db   : > { %v1282_v21 = vmax.f32 %v1237_v28, 0.0  ;;  %v2126_v28 = vld [vmem:[%s3165_s6 + $0x80] sm:$0xff] }
 0x2dc   : > { %1863 = vmatpush.bf16.msrb.mxu0 %v1570_v14  ;;  %2713 = vmatpush.bf16.msra.mxu2 %v1570_v14 }
 0x2dd   : > { %2714 = vmatpush.bf16.msra.mxu3 %v1570_v14  ;;  %2028 = vmax.xlane.f32.xlu0 %v1282_v21  ;;  %v2127_v21 = vld [vmem:[%s3165_s6 + $0x88] sm:$0xff] }
 0x2df   : > { %v2001_v27 = vpop.xlane.xlu1 %2000 }
 0x2e0   : > { %v1239_v51 = vpop.f32.mrf.mxu1  ;;  %v2183_v43 = vmax.f32 %v2119_v13, %v2001_v27  ;;  %1864 = vmatpush.bf16.msrb.mxu0 %v1569_v54  ;;  %2715 = vmatpush.bf16.msra.mxu2 %v1569_v54  ;;  %v2128_v27 = vld [vmem:[%s3165_s6 + $0x90] sm:$0xff] }
 0x2e1   : > { %v1240_v19 = vadd.f32 %v1239_v51, %v3849_v22  ;;  %2716 = vmatpush.bf16.msra.mxu3 %v1569_v54  ;;  %v2691_v54 = vld [vmem:[#allocation6 + $0x30] sm:$0xff] }
 0x2e2   : > { %2248 = vst.msk [vmem:[%s3165_s6 + $0x48] sm:$0xff] %vm2238_vm5, %v2183_v43 }
 0x2e3   : > { %v1283_v39 = vmax.f32 %v1240_v19, 0.0  ;;  %v2129_v19 = vld [vmem:[%s3165_s6 + $0x98] sm:$0xff] }
 0x2e4   : > { %1865 = vmatpush.bf16.msrb.mxu0 %v4008_v53  ;;  %2717 = vmatpush.bf16.msra.mxu2 %v4008_v53 }
 0x2e5   : > { %2718 = vmatpush.bf16.msra.mxu3 %v4008_v53  ;;  %2030 = vmax.xlane.f32.xlu1 %v1283_v39  ;;  %v2121_v53 = vld [vmem:[%s3165_s6 + $0x58] sm:$0xff] }
 0x2e7   : > { %v2003_v45 = vpop.xlane.xlu2 %2002 }
 0x2e8   : > { %v1241_v52 = vpop.f32.mrf.mxu1  ;;  %v2184_v63 = vmax.f32 %v2120_v7, %v2003_v45  ;;  %1866 = vmatpush.bf16.msrb.mxu0 %v3992_v30  ;;  %2719 = vmatpush.bf16.msra.mxu2 %v3992_v30  ;;  %v2692_v7 = vld [vmem:[#allocation6 + $0x38] sm:$0xff] }
 0x2e9   : > { %v1242_v22 = vadd.f32 %v1241_v52, %v3852_v26  ;;  %2720 = vmatpush.bf16.msra.mxu3 %v3992_v30  ;;  %v2686_v26 = vld [vmem:[#allocation6 + $0x8] sm:$0xff]  ;;  %v2688_v30 = vld [vmem:[#allocation6 + $0x18] sm:$0xff] }
 0x2ea   : > { %2249 = vst.msk [vmem:[%s3165_s6 + $0x50] sm:$0xff] %vm2238_vm5, %v2184_v63  ;;  %v2130_v52 = vld [vmem:[%s3165_s6 + $0xa0] sm:$0xff] }
 0x2eb   : > { %v1284_v18 = vmax.f32 %v1242_v22, 0.0 }
 0x2ec   : > { %1867 = vmatpush.bf16.msrb.mxu0 %v3976_v9  ;;  %2721 = vmatpush.bf16.msra.mxu2 %v3976_v9 }
 0x2ed   : > { %2722 = vmatpush.bf16.msra.mxu3 %v3976_v9  ;;  %2032 = vmax.xlane.f32.xlu2 %v1284_v18  ;;  %v2122_v9 = vld [vmem:[%s3165_s6 + $0x60] sm:$0xff]  ;;  %v2131_v18 = vld [vmem:[%s3165_s6 + $0xa8] sm:$0xff] }
 0x2ef   : > { %v2005_v44 = vpop.xlane.xlu0 %2004 }
 0x2f0   : > { %v2185_v8 = vmax.f32 %v2121_v53, %v2005_v44  ;;  %1868 = vmatpush.bf16.msrb.mxu0 %v3960_v34  ;;  %2723 = vmatpush.bf16.msra.mxu2 %v3960_v34  ;;  %v2693_v44 = vld [vmem:[#allocation6 + $0x40] sm:$0xff] }
 0x2f1   : > { %2724 = vmatpush.bf16.msra.mxu3 %v3960_v34  ;;  %v2689_v34 = vld [vmem:[#allocation6 + $0x20] sm:$0xff] }
 0x2f2   : > { %2250 = vst.msk [vmem:[%s3165_s6 + $0x58] sm:$0xff] %vm2238_vm5, %v2185_v8 }
 0x2f3   : > { %1869 = vmatmul.bf16.vlgmr.msrb.gmra.mxu0 %v2685_v58  ;;  %1874 = vmatmul.bf16.vlgmr.msra.gmra.mxu2 %v2686_v26  ;;  %v2132_v26 = vld [vmem:[%s3165_s6 + $0xb0] sm:$0xff] }
 0x2f4   : > { %1884 = vmatmul.bf16.vlgmr.msra.gmra.mxu3 %v2688_v30 }
 0x2f7   : > { %v2007_v12 = vpop.xlane.xlu1 %2006 }
 0x2f8   : > { %v2186_v36 = vmax.f32 %v2122_v9, %v2007_v12  ;;  %v2133_v9 = vld [vmem:[%s3165_s6 + $0xb8] sm:$0xff] }
 0x2fa   : > { %2251 = vst.msk [vmem:[%s3165_s6 + $0x60] sm:$0xff] %vm2238_vm5, %v2186_v36  ;;  %v2694_v36 = vld [vmem:[#allocation6 + $0x48] sm:$0xff] }
 0x2ff   : > { %v2009_v48 = vpop.xlane.xlu2 %2008 }
 0x300   : > { %v2187_v50 = vmax.f32 %v2123_v61, %v2009_v48  ;;  %v2134_v48 = vld [vmem:[%s3165_s6 + $0xc0] sm:$0xff] }
 0x302   : > { %2252 = vst.msk [vmem:[%s3165_s6 + $0x68] sm:$0xff] %vm2238_vm5, %v2187_v50 }
 0x303   : > { %1879 = vmatmul.bf16.gmra.mxu2 %v2687_v60 }
 0x304   : > { %1889 = vmatmul.bf16.gmra.mxu3 %v2689_v34  ;;  %v2135_v34 = vld [vmem:[%s3165_s6 + $0xc8] sm:$0xff] }
 0x307   : > { %v2011_v62 = vpop.xlane.xlu0 %2010 }
 0x308   : > { %v2188_v42 = vmax.f32 %v2124_v40, %v2011_v62  ;;  %v2695_v62 = vld [vmem:[#allocation6 + $0x50] sm:$0xff] }
 0x30a   : > { %2253 = vst.msk [vmem:[%s3165_s6 + $0x70] sm:$0xff] %vm2238_vm5, %v2188_v42 }
 0x30f   : > { %v2013_v11 = vpop.xlane.xlu1 %2012 }
 0x310   : > { %v2189_v17 = vmax.f32 %v2125_v23, %v2013_v11  ;;  %v2696_v11 = vld [vmem:[#allocation6 + $0x58] sm:$0xff] }
 0x312   : > { %2254 = vst.msk [vmem:[%s3165_s6 + $0x78] sm:$0xff] %vm2238_vm5, %v2189_v17 }
 0x314   : > { %1894 = vmatmul.bf16.gmra.mxu3 %v2690_v6 }
 0x317   : > { %v2015_v59 = vpop.xlane.xlu2 %2014 }
 0x318   : > { %v2190_v14 = vmax.f32 %v2126_v28, %v2015_v59 }
 0x31a   : > { %2255 = vst.msk [vmem:[%s3165_s6 + $0x80] sm:$0xff] %vm2238_vm5, %v2190_v14 }
 0x31f   : > { %v2017_v38 = vpop.xlane.xlu0 %2016 }
 0x320   : > { %v2191_v13 = vmax.f32 %v2127_v21, %v2017_v38 }
 0x322   : > { %2256 = vst.msk [vmem:[%s3165_s6 + $0x88] sm:$0xff] %vm2238_vm5, %v2191_v13 }
 0x324   : > { %1899 = vmatmul.bf16.gmra.mxu3 %v2691_v54 }
 0x328   : > { %v2019_v51 = vpop.xlane.xlu1 %2018 }
 0x329   : > { %v2192_v43 = vmax.f32 %v2128_v27, %v2019_v51 }
 0x32b   : > { %2257 = vst.msk [vmem:[%s3165_s6 + $0x90] sm:$0xff] %vm2238_vm5, %v2192_v43 }
 0x330   : > { %v2021_v39 = vpop.xlane.xlu2 %2020 }
 0x331   : > { %v2193_v45 = vmax.f32 %v2129_v19, %v2021_v39 }
 0x333   : > { %2258 = vst.msk [vmem:[%s3165_s6 + $0x98] sm:$0xff] %vm2238_vm5, %v2193_v45 }
 0x334   : > { %1904 = vmatmul.bf16.gmra.mxu3 %v2692_v7  ;;  %v2697_v7 = vld [vmem:[#allocation6 + $0x60] sm:$0xff] }
 0x338   : > { %v2023_v63 = vpop.xlane.xlu0 %2022 }
 0x339   : > { %v2194_v22 = vmax.f32 %v2130_v52, %v2023_v63 }
 0x33b   : > { %2259 = vst.msk [vmem:[%s3165_s6 + $0xa0] sm:$0xff] %vm2238_vm5, %v2194_v22 }
 0x340   : > { %v2025_v53 = vpop.xlane.xlu1 %2024 }
 0x341   : > { %v2195_v58 = vmax.f32 %v2131_v18, %v2025_v53 }
 0x343   : > { %2260 = vst.msk [vmem:[%s3165_s6 + $0xa8] sm:$0xff] %vm2238_vm5, %v2195_v58  ;;  %v2698_v58 = vld [vmem:[#allocation6 + $0x68] sm:$0xff] }
 0x344   : > { %1909 = vmatmul.bf16.gmra.mxu3 %v2693_v44 }
 0x348   : > { %v2027_v8 = vpop.xlane.xlu2 %2026 }
 0x349   : > { %v2196_v30 = vmax.f32 %v2132_v26, %v2027_v8 }
 0x34b   : > { %2261 = vst.msk [vmem:[%s3165_s6 + $0xb0] sm:$0xff] %vm2238_vm5, %v2196_v30 }
 0x350   : > { %v2029_v12 = vpop.xlane.xlu0 %2028 }
 0x351   : > { %v2197_v61 = vmax.f32 %v2133_v9, %v2029_v12 }
 0x353   : > { %2262 = vst.msk [vmem:[%s3165_s6 + $0xb8] sm:$0xff] %vm2238_vm5, %v2197_v61 }
 0x354   : > { %1914 = vmatmul.bf16.gmra.mxu3 %v2694_v36  ;;  %v2699_v36 = vld [vmem:[#allocation6 + $0x70] sm:$0xff] }
 0x358   : > { %v2031_v60 = vpop.xlane.xlu1 %2030 }
 0x359   : > { %v2198_v50 = vmax.f32 %v2134_v48, %v2031_v60 }
 0x35b   : > { %2263 = vst.msk [vmem:[%s3165_s6 + $0xc0] sm:$0xff] %vm2238_vm5, %v2198_v50 }
 0x360   : > { %v2033_v40 = vpop.xlane.xlu2 %2032 }
 0x361   : > { %v2199_v42 = vmax.f32 %v2135_v34, %v2033_v40  ;;  %v2700_v34 = vld [vmem:[#allocation6 + $0x78] sm:$0xff] }
 0x363   : > { %2264 = vst.msk [vmem:[%s3165_s6 + $0xc8] sm:$0xff] %vm2238_vm5, %v2199_v42 }
 0x364   : > { %1919 = vmatmul.bf16.gmra.mxu3 %v2695_v62 }
 0x370   : > { %v1870_v23 = vpop.f32.mrf.mxu0 }
 0x371   : > { %v1871_v17 = vadd.f32 %v1870_v23, %v3913_v55 }
 0x373   : > { %v1950_v6 = vmax.f32 %v1871_v17, 0.0 }
 0x374   : > { %1924 = vmatmul.bf16.gmra.mxu3 %v2696_v11 }
 0x375   : > { %2046 = vmax.xlane.f32.xlu0 %v1950_v6 }
 0x376   : > { %v1875_v28 = vpop.f32.mrf.mxu2 }
 0x377   : > { %v1876_v59 = vadd.f32 %v1875_v28, %v3917_v0  ;;  %v1885_v14 = vpop.f32.mrf.mxu3 }
 0x378   : > { %v1886_v21 = vadd.f32 %v1885_v14, %v3933_v29  ;;  %v1872_v38 = vpop.f32.mrf.mxu0 }
 0x379   : > { %v1952_v13 = vmax.f32 %v1876_v59, 0.0  ;;  %v1873_v54 = vadd.f32 %v1872_v38, %v3919_v1 }
 0x37a   : > { %v1956_v27 = vmax.f32 %v1886_v21, 0.0 }
 0x37b   : > { %v1951_v51 = vmax.f32 %v1873_v54, 0.0  ;;  %2050 = vmax.xlane.f32.xlu2 %v1952_v13  ;;  %v2142_v13 = vld [vmem:[%s3165_s6 + $0x100] sm:$0xff] }
 0x37d   : > { %2048 = vmax.xlane.f32.xlu1 %v1951_v51  ;;  %2058 = vmax.xlane.f32.xlu0 %v1956_v27  ;;  %v4351_v27 = vld [vmem:[#allocation11_spill] sm:$0xff] }
 0x37e   : > { %v1877_v43 = vpop.f32.mrf.mxu2 }
 0x37f   : > { %v1878_v55 = vadd.f32 %v1877_v43, %v3921_v10  ;;  %v1887_v19 = vpop.f32.mrf.mxu3 }
 0x380   : > { %v1888_v39 = vadd.f32 %v1887_v19, %v3940_v15 }
 0x381   : > { %v1953_v0 = vmax.f32 %v1878_v55, 0.0 }
 0x382   : > { %v1957_v45 = vmax.f32 %v1888_v39, 0.0  ;;  %v2148_v39 = vld [vmem:[%s3165_s6 + $0x130] sm:$0xff] }
 0x384   : > { %1929 = vmatmul.bf16.gmra.mxu3 %v2697_v7 }
 0x385   : > { %2060 = vmax.xlane.f32.xlu1 %v1957_v45  ;;  %2052 = vmax.xlane.f32.xlu0 %v1953_v0  ;;  %v4352_v45 = vld [vmem:[#allocation12_spill] sm:$0xff] }
 0x386   : > { %v1880_v29 = vpop.f32.mrf.mxu2 }
 0x387   : > { %v1881_v1 = vadd.f32 %v1880_v29, %v3930_v41  ;;  %v1890_v52 = vpop.f32.mrf.mxu3 }
 0x388   : > { %v1891_v63 = vadd.f32 %v1890_v52, %v3938_v46 }
 0x389   : > { %v1954_v18 = vmax.f32 %v1881_v1, 0.0 }
 0x38a   : > { %v1958_v22 = vmax.f32 %v1891_v63, 0.0 }
 0x38c   : > { %2062 = vmax.xlane.f32.xlu2 %v1958_v22 }
 0x38d   : > { %2054 = vmax.xlane.f32.xlu1 %v1954_v18 }
 0x38e   : > { %v1882_v10 = vpop.f32.mrf.mxu2 }
 0x38f   : > { %v1883_v53 = vadd.f32 %v1882_v10, %v3928_v3  ;;  %v1892_v15 = vpop.f32.mrf.mxu3  ;;  %v2149_v10 = vld [vmem:[%s3165_s6 + $0x138] sm:$0xff] }
 0x390   : > { %v1893_v44 = vadd.f32 %v1892_v15, %v3943_v4 }
 0x391   : > { %v1955_v26 = vmax.f32 %v1883_v53, 0.0  ;;  %v2145_v53 = vld [vmem:[%s3165_s6 + $0x118] sm:$0xff] }
 0x392   : > { %v1959_v8 = vmax.f32 %v1893_v44, 0.0 }
 0x394   : > { %1934 = vmatmul.bf16.gmra.mxu3 %v2698_v58  ;;  %2064 = vmax.xlane.f32.xlu0 %v1959_v8 }
 0x395   : > { %2056 = vmax.xlane.f32.xlu2 %v1955_v26 }
 0x397   : > { %v1895_v41 = vpop.f32.mrf.mxu3 }
 0x398   : > { %v1896_v30 = vadd.f32 %v1895_v41, %v3948_v2 }
 0x39a   : > { %v1960_v46 = vmax.f32 %v1896_v30, 0.0 }
 0x39c   : > { %2066 = vmax.xlane.f32.xlu1 %v1960_v46  ;;  %v2150_v46 = vld [vmem:[%s3165_s6 + $0x140] sm:$0xff] }
 0x39f   : > { %v1897_v9 = vpop.f32.mrf.mxu3 }
 0x3a0   : > { %v1898_v12 = vadd.f32 %v1897_v9, %v3946_v16  ;;  %v2146_v9 = vld [vmem:[%s3165_s6 + $0x120] sm:$0xff] }
 0x3a2   : > { %v1961_v61 = vmax.f32 %v1898_v12, 0.0 }
 0x3a4   : > { %1939 = vmatmul.bf16.gmra.mxu3 %v2699_v36  ;;  %2068 = vmax.xlane.f32.xlu2 %v1961_v61 }
 0x3a7   : > { %v1900_v3 = vpop.f32.mrf.mxu3 }
 0x3a8   : > { %v1901_v4 = vadd.f32 %v1900_v3, %v3951_v35 }
 0x3aa   : > { %v1962_v48 = vmax.f32 %v1901_v4, 0.0 }
 0x3ac   : > { %2070 = vmax.xlane.f32.xlu0 %v1962_v48 }
 0x3af   : > { %v1902_v60 = vpop.f32.mrf.mxu3 }
 0x3b0   : > { %v1903_v50 = vadd.f32 %v1902_v60, %v3957_v20  ;;  %v2151_v60 = vld [vmem:[%s3165_s6 + $0x148] sm:$0xff] }
 0x3b2   : > { %v1963_v40 = vmax.f32 %v1903_v50, 0.0  ;;  %v2147_v50 = vld [vmem:[%s3165_s6 + $0x128] sm:$0xff] }
 0x3b4   : > { %1944 = vmatmul.bf16.gmra.mxu3 %v2700_v34  ;;  %2072 = vmax.xlane.f32.xlu1 %v1963_v40 }
 0x3b7   : > { %v1905_v2 = vpop.f32.mrf.mxu3 }
 0x3b8   : > { %v1906_v62 = vadd.f32 %v1905_v2, %v3954_v57 }
 0x3ba   : > { %v1964_v16 = vmax.f32 %v1906_v62, 0.0 }
 0x3bc   : > { %2074 = vmax.xlane.f32.xlu2 %v1964_v16 }
 0x3bf   : > { %v1907_v42 = vpop.f32.mrf.mxu3 }
 0x3c0   : > { %v1908_v23 = vadd.f32 %v1907_v42, %v3962_v31 }
 0x3c2   : > { %v1965_v11 = vmax.f32 %v1908_v23, 0.0  ;;  %v2152_v23 = vld [vmem:[%s3165_s6 + $0x150] sm:$0xff] }
 0x3c4   : > { %2076 = vmax.xlane.f32.xlu0 %v1965_v11 }
 0x3c7   : > { %v1910_v35 = vpop.f32.mrf.mxu3 }
 0x3c8   : > { %v1911_v17 = vadd.f32 %v1910_v35, %v3967_v56 }
 0x3ca   : > { %v1966_v6 = vmax.f32 %v1911_v17, 0.0 }
 0x3cc   : > { %2078 = vmax.xlane.f32.xlu1 %v1966_v6 }
 0x3cf   : > { %v1912_v20 = vpop.f32.mrf.mxu3 }
 0x3d0   : > { %v1913_v28 = vadd.f32 %v1912_v20, %v3964_v37 }
 0x3d2   : > { %v1967_v59 = vmax.f32 %v1913_v28, 0.0 }
 0x3d4   : > { %2080 = vmax.xlane.f32.xlu2 %v1967_v59 }
 0x3d7   : > { %v1915_v57 = vpop.f32.mrf.mxu3 }
 0x3d8   : > { %v1916_v14 = vadd.f32 %v1915_v57, %v3970_v33  ;;  %v2144_v33 = vld [vmem:[%s3165_s6 + $0x110] sm:$0xff] }
 0x3da   : > { %v1968_v21 = vmax.f32 %v1916_v14, 0.0 }
 0x3dc   : > { %2082 = vmax.xlane.f32.xlu0 %v1968_v21 }
 0x3df   : > { %v1917_v31 = vpop.f32.mrf.mxu3 }
 0x3e0   : > { %v1918_v38 = vadd.f32 %v1917_v31, %v3978_v24  ;;  %v2143_v24 = vld [vmem:[%s3165_s6 + $0x108] sm:$0xff]  ;;  %v2154_v31 = vld [vmem:[%s3165_s6 + $0x160] sm:$0xff] }
 0x3e2   : > { %v1969_v56 = vmax.f32 %v1918_v38, 0.0 }
 0x3e4   : > { %2084 = vmax.xlane.f32.xlu1 %v1969_v56  ;;  %v4353_v56 = vld [vmem:[#allocation13_spill] sm:$0xff] }
 0x3e7   : > { %v1920_v54 = vpop.f32.mrf.mxu3 }
 0x3e8   : > { %v1921_v37 = vadd.f32 %v1920_v54, %v4351_v27  ;;  %v2047_v51 = vpop.xlane.xlu0 %2046 }
 0x3e9   : > { %v2206_v43 = vmax.f32 %v2142_v13, %v2047_v51 }
 0x3ea   : > { %v1970_v55 = vmax.f32 %v1921_v37, 0.0  ;;  %v2155_v37 = vld [vmem:[%s3165_s6 + $0x168] sm:$0xff] }
 0x3eb   : > { %2271 = vst.msk [vmem:[%s3165_s6 + $0x100] sm:$0xff] %vm2238_vm5, %v2206_v43  ;;  %v4354_v43 = vld [vmem:[#allocation15_spill] sm:$0xff] }
 0x3ec   : > { %2086 = vmax.xlane.f32.xlu2 %v1970_v55 }
 0x3ee   : > { %v2051_v19 = vpop.xlane.xlu2 %2050 }
 0x3ef   : > { %v1922_v7 = vpop.f32.mrf.mxu3  ;;  %v2208_v0 = vmax.f32 %v2144_v33, %v2051_v19 }
 0x3f0   : > { %v1923_v29 = vadd.f32 %v1922_v7, %v4352_v45  ;;  %v2049_v1 = vpop.xlane.xlu1 %2048  ;;  %v2059_v52 = vpop.xlane.xlu0 %2058 }
 0x3f1   : > { %2273 = vst.msk [vmem:[%s3165_s6 + $0x110] sm:$0xff] %vm2238_vm5, %v2208_v0  ;;  %v2207_v63 = vmax.f32 %v2143_v24, %v2049_v1  ;;  %v2212_v22 = vmax.f32 %v2148_v39, %v2059_v52  ;;  %v2156_v24 = vld [vmem:[%s3165_s6 + $0x170] sm:$0xff]  ;;  %v4355_v0 = vld [vmem:[#allocation14_spill] sm:$0xff]  ;;  %v2157_v52 = vld [vmem:[%s3165_s6 + $0x178] sm:$0xff] }
 0x3f2   : > { %v1971_v18 = vmax.f32 %v1923_v29, 0.0 }
 0x3f3   : > { %2272 = vst.msk [vmem:[%s3165_s6 + $0x108] sm:$0xff] %vm2238_vm5, %v2207_v63 }
 0x3f4   : > { %2277 = vst.msk [vmem:[%s3165_s6 + $0x130] sm:$0xff] %vm2238_vm5, %v2212_v22  ;;  %2088 = vmax.xlane.f32.xlu0 %v1971_v18  ;;  %v4356_v18 = vld [vmem:[#allocation16_spill] sm:$0xff] }
 0x3f7   : > { %v1925_v15 = vpop.f32.mrf.mxu3 }
 0x3f8   : > { %v1926_v44 = vadd.f32 %v1925_v15, %v3986_v5  ;;  %v2061_v58 = vpop.xlane.xlu1 %2060  ;;  %v2053_v26 = vpop.xlane.xlu0 %2052 }
 0x3f9   : > { %v2213_v8 = vmax.f32 %v2149_v10, %v2061_v58  ;;  %v2209_v41 = vmax.f32 %v2145_v53, %v2053_v26 }
 0x3fa   : > { %v1972_v30 = vmax.f32 %v1926_v44, 0.0  ;;  %v2158_v44 = vld [vmem:[%s3165_s6 + $0x180] sm:$0xff] }
 0x3fb   : > { %2278 = vst.msk [vmem:[%s3165_s6 + $0x138] sm:$0xff] %vm2238_vm5, %v2213_v8  ;;  %v4357_v8 = vld [vmem:[#allocation17_spill] sm:$0xff] }
 0x3fc   : > { %2274 = vst.msk [vmem:[%s3165_s6 + $0x118] sm:$0xff] %vm2238_vm5, %v2209_v41  ;;  %2090 = vmax.xlane.f32.xlu1 %v1972_v30 }
 0x3ff   : > { %v1927_v12 = vpop.f32.mrf.mxu3  ;;  %v2063_v36 = vpop.xlane.xlu2 %2062 }
 0x400   : > { %v1928_v5 = vadd.f32 %v1927_v12, %v3983_v49  ;;  %v2214_v61 = vmax.f32 %v2150_v46, %v2063_v36  ;;  %v2055_v3 = vpop.xlane.xlu1 %2054 }
 0x401   : > { %v2210_v4 = vmax.f32 %v2146_v9, %v2055_v3  ;;  %v2159_v9 = vld [vmem:[%s3165_s6 + $0x188] sm:$0xff] }
 0x402   : > { %v1973_v48 = vmax.f32 %v1928_v5, 0.0  ;;  %2279 = vst.msk [vmem:[%s3165_s6 + $0x140] sm:$0xff] %vm2238_vm5, %v2214_v61  ;;  %v2160_v5 = vld [vmem:[%s3165_s6 + $0x190] sm:$0xff] }
 0x403   : > { %2275 = vst.msk [vmem:[%s3165_s6 + $0x120] sm:$0xff] %vm2238_vm5, %v2210_v4  ;;  %v2161_v4 = vld [vmem:[%s3165_s6 + $0x198] sm:$0xff] }
 0x404   : > { %2092 = vmax.xlane.f32.xlu2 %v1973_v48 }
 0x407   : > { %v1930_v34 = vpop.f32.mrf.mxu3  ;;  %v2065_v40 = vpop.xlane.xlu0 %2064 }
 0x408   : > { %v1931_v2 = vadd.f32 %v1930_v34, %v3990_v32  ;;  %v2215_v49 = vmax.f32 %v2151_v60, %v2065_v40  ;;  %v2057_v62 = vpop.xlane.xlu2 %2056  ;;  %v2153_v32 = vld [vmem:[%s3165_s6 + $0x158] sm:$0xff] }
 0x409   : > { %v2211_v16 = vmax.f32 %v2147_v50, %v2057_v62  ;;  %v2162_v50 = vld [vmem:[%s3165_s6 + $0x1a0] sm:$0xff] }
 0x40a   : > { %v1974_v42 = vmax.f32 %v1931_v2, 0.0  ;;  %2280 = vst.msk [vmem:[%s3165_s6 + $0x148] sm:$0xff] %vm2238_vm5, %v2215_v49  ;;  %v2163_v2 = vld [vmem:[%s3165_s6 + $0x1a8] sm:$0xff] }
 0x40b   : > { %2276 = vst.msk [vmem:[%s3165_s6 + $0x128] sm:$0xff] %vm2238_vm5, %v2211_v16  ;;  %v2164_v16 = vld [vmem:[%s3165_s6 + $0x1b0] sm:$0xff] }
 0x40c   : > { %2094 = vmax.xlane.f32.xlu0 %v1974_v42 }
 0x40f   : > { %v1932_v11 = vpop.f32.mrf.mxu3  ;;  %v2067_v35 = vpop.xlane.xlu1 %2066 }
 0x410   : > { %v1933_v17 = vadd.f32 %v1932_v11, %v3996_v25  ;;  %v2216_v6 = vmax.f32 %v2152_v23, %v2067_v35  ;;  %v2165_v11 = vld [vmem:[%s3165_s6 + $0x1b8] sm:$0xff] }
 0x412   : > { %v1975_v20 = vmax.f32 %v1933_v17, 0.0  ;;  %2281 = vst.msk [vmem:[%s3165_s6 + $0x150] sm:$0xff] %vm2238_vm5, %v2216_v6  ;;  %v2166_v6 = vld [vmem:[%s3165_s6 + $0x1c0] sm:$0xff] }
 0x414   : > { %2096 = vmax.xlane.f32.xlu1 %v1975_v20 }
 0x417   : > { %v1935_v28 = vpop.f32.mrf.mxu3  ;;  %v2069_v59 = vpop.xlane.xlu2 %2068 }
 0x418   : > { %v1936_v57 = vadd.f32 %v1935_v28, %v3994_v47  ;;  %v2217_v14 = vmax.f32 %v2153_v32, %v2069_v59  ;;  %v2167_v28 = vld [vmem:[%s3165_s6 + $0x1c8] sm:$0xff] }
 0x41a   : > { %v1976_v21 = vmax.f32 %v1936_v57, 0.0  ;;  %2282 = vst.msk [vmem:[%s3165_s6 + $0x158] sm:$0xff] %vm2238_vm5, %v2217_v14  ;;  %v2168_v14 = vld [vmem:[%s3165_s6 + $0x1d0] sm:$0xff] }
 0x41c   : > { %2098 = vmax.xlane.f32.xlu2 %v1976_v21 }
 0x41f   : > { %v1937_v25 = vpop.f32.mrf.mxu3  ;;  %v2071_v38 = vpop.xlane.xlu0 %2070 }
 0x420   : > { %v1938_v13 = vadd.f32 %v1937_v25, %v4353_v56  ;;  %v2218_v54 = vmax.f32 %v2154_v31, %v2071_v38  ;;  %v2169_v25 = vld [vmem:[%s3165_s6 + $0x1d8] sm:$0xff] }
 0x422   : > { %v1977_v27 = vmax.f32 %v1938_v13, 0.0  ;;  %2283 = vst.msk [vmem:[%s3165_s6 + $0x160] sm:$0xff] %vm2238_vm5, %v2218_v54  ;;  %v2170_v13 = vld [vmem:[%s3165_s6 + $0x1e0] sm:$0xff] }
 0x424   : > { %2100 = vmax.xlane.f32.xlu0 %v1977_v27 }
 0x427   : > { %v1940_v47 = vpop.f32.mrf.mxu3  ;;  %v2073_v51 = vpop.xlane.xlu1 %2072 }
 0x428   : > { %v1941_v55 = vadd.f32 %v1940_v47, %v4354_v43  ;;  %v2219_v33 = vmax.f32 %v2155_v37, %v2073_v51  ;;  %v2171_v37 = vld [vmem:[%s3165_s6 + $0x1e8] sm:$0xff]  ;;  %v2172_v43 = vld [vmem:[%s3165_s6 + $0x1f0] sm:$0xff] }
 0x42a   : > { %v1978_v19 = vmax.f32 %v1941_v55, 0.0  ;;  %2284 = vst.msk [vmem:[%s3165_s6 + $0x168] sm:$0xff] %vm2238_vm5, %v2219_v33 }
 0x42c   : > { %2102 = vmax.xlane.f32.xlu1 %v1978_v19  ;;  %v2173_v19 = vld [vmem:[%s3165_s6 + $0x1f8] sm:$0xff] }
 0x42f   : > { %v1942_v39 = vpop.f32.mrf.mxu3  ;;  %v2075_v7 = vpop.xlane.xlu2 %2074 }
 0x430   : > { %v1943_v45 = vadd.f32 %v1942_v39, %v4355_v0  ;;  %v2220_v29 = vmax.f32 %v2156_v24, %v2075_v7 }
 0x432   : > { %v1979_v1 = vmax.f32 %v1943_v45, 0.0  ;;  %2285 = vst.msk [vmem:[%s3165_s6 + $0x170] sm:$0xff] %vm2238_vm5, %v2220_v29 }
 0x434   : > { %2104 = vmax.xlane.f32.xlu2 %v1979_v1 }
 0x437   : > { %v1945_v63 = vpop.f32.mrf.mxu3  ;;  %v2077_v22 = vpop.xlane.xlu0 %2076 }
 0x438   : > { %v1946_v10 = vadd.f32 %v1945_v63, %v4356_v18  ;;  %v2221_v53 = vmax.f32 %v2157_v52, %v2077_v22 }
 0x43a   : > { %v1980_v15 = vmax.f32 %v1946_v10, 0.0  ;;  %2286 = vst.msk [vmem:[%s3165_s6 + $0x178] sm:$0xff] %vm2238_vm5, %v2221_v53 }
 0x43c   : > { %2106 = vmax.xlane.f32.xlu0 %v1980_v15 }
 0x43f   : > { %v1947_v58 = vpop.f32.mrf.mxu3  ;;  %v2079_v26 = vpop.xlane.xlu1 %2078 }
 0x440   : > { %v1948_v41 = vadd.f32 %v1947_v58, %v4357_v8  ;;  %v2222_v30 = vmax.f32 %v2158_v44, %v2079_v26 }
 0x442   : > { %v1981_v46 = vmax.f32 %v1948_v41, 0.0  ;;  %2287 = vst.msk [vmem:[%s3165_s6 + $0x180] sm:$0xff] %vm2238_vm5, %v2222_v30 }
 0x444   : > { %2108 = vmax.xlane.f32.xlu1 %v1981_v46 }
 0x447   : > { %v2081_v12 = vpop.xlane.xlu2 %2080 }
 0x448   : > { %v2223_v36 = vmax.f32 %v2159_v9, %v2081_v12 }
 0x44a   : > { %2288 = vst.msk [vmem:[%s3165_s6 + $0x188] sm:$0xff] %vm2238_vm5, %v2223_v36 }
 0x44f   : > { %v2083_v61 = vpop.xlane.xlu0 %2082 }
 0x450   : > { %v2224_v3 = vmax.f32 %v2160_v5, %v2083_v61 }
 0x452   : > { %2289 = vst.msk [vmem:[%s3165_s6 + $0x190] sm:$0xff] %vm2238_vm5, %v2224_v3 }
 0x457   : > { %v2085_v48 = vpop.xlane.xlu1 %2084 }
 0x458   : > { %v2225_v60 = vmax.f32 %v2161_v4, %v2085_v48 }
 0x45a   : > { %2290 = vst.msk [vmem:[%s3165_s6 + $0x198] sm:$0xff] %vm2238_vm5, %v2225_v60 }
 0x45f   : > { %v2087_v34 = vpop.xlane.xlu2 %2086 }
 0x460   : > { %v2226_v40 = vmax.f32 %v2162_v50, %v2087_v34 }
 0x462   : > { %2291 = vst.msk [vmem:[%s3165_s6 + $0x1a0] sm:$0xff] %vm2238_vm5, %v2226_v40 }
 0x467   : > { %v2089_v49 = vpop.xlane.xlu0 %2088 }
 0x468   : > { %v2227_v62 = vmax.f32 %v2163_v2, %v2089_v49 }
 0x46a   : > { %2292 = vst.msk [vmem:[%s3165_s6 + $0x1a8] sm:$0xff] %vm2238_vm5, %v2227_v62 }
 0x46f   : > { %v2091_v42 = vpop.xlane.xlu1 %2090 }
 0x470   : > { %v2228_v23 = vmax.f32 %v2164_v16, %v2091_v42 }
 0x472   : > { %2293 = vst.msk [vmem:[%s3165_s6 + $0x1b0] sm:$0xff] %vm2238_vm5, %v2228_v23 }
 0x477   : > { %v2093_v35 = vpop.xlane.xlu2 %2092 }
 0x478   : > { %v2229_v17 = vmax.f32 %v2165_v11, %v2093_v35 }
 0x47a   : > { %2294 = vst.msk [vmem:[%s3165_s6 + $0x1b8] sm:$0xff] %vm2238_vm5, %v2229_v17 }
 0x47f   : > { %v2095_v20 = vpop.xlane.xlu0 %2094 }
 0x480   : > { %v2230_v32 = vmax.f32 %v2166_v6, %v2095_v20 }
 0x482   : > { %2295 = vst.msk [vmem:[%s3165_s6 + $0x1c0] sm:$0xff] %vm2238_vm5, %v2230_v32 }
 0x487   : > { %v2097_v59 = vpop.xlane.xlu1 %2096 }
 0x488   : > { %v2231_v57 = vmax.f32 %v2167_v28, %v2097_v59 }
 0x48a   : > { %2296 = vst.msk [vmem:[%s3165_s6 + $0x1c8] sm:$0xff] %vm2238_vm5, %v2231_v57 }
 0x48f   : > { %v2099_v21 = vpop.xlane.xlu2 %2098 }
 0x490   : > { %v2232_v31 = vmax.f32 %v2168_v14, %v2099_v21 }
 0x492   : > { %2297 = vst.msk [vmem:[%s3165_s6 + $0x1d0] sm:$0xff] %vm2238_vm5, %v2232_v31 }
 0x497   : > { %v2101_v38 = vpop.xlane.xlu0 %2100 }
 0x498   : > { %v2233_v56 = vmax.f32 %v2169_v25, %v2101_v38 }
 0x49a   : > { %2298 = vst.msk [vmem:[%s3165_s6 + $0x1d8] sm:$0xff] %vm2238_vm5, %v2233_v56 }
 0x49f   : > { %v2103_v54 = vpop.xlane.xlu1 %2102 }
 0x4a0   : > { %v2234_v27 = vmax.f32 %v2170_v13, %v2103_v54 }
 0x4a2   : > { %2299 = vst.msk [vmem:[%s3165_s6 + $0x1e0] sm:$0xff] %vm2238_vm5, %v2234_v27 }
 0x4a7   : > { %v2105_v47 = vpop.xlane.xlu2 %2104 }
 0x4a8   : > { %v2235_v51 = vmax.f32 %v2171_v37, %v2105_v47 }
 0x4aa   : > { %2300 = vst.msk [vmem:[%s3165_s6 + $0x1e8] sm:$0xff] %vm2238_vm5, %v2235_v51 }
 0x4af   : > { %v2107_v55 = vpop.xlane.xlu0 %2106 }
 0x4b0   : > { %v2236_v33 = vmax.f32 %v2172_v43, %v2107_v55 }
 0x4b2   : > { %2301 = vst.msk [vmem:[%s3165_s6 + $0x1f0] sm:$0xff] %vm2238_vm5, %v2236_v33 }
 0x4b7   : > { %v2109_v24 = vpop.xlane.xlu1 %2108 }
 0x4b8   : > { %v2237_v39 = vmax.f32 %v2173_v19, %v2109_v24 }
 0x4ba   : > { %2302 = vst.msk [vmem:[%s3165_s6 + $0x1f8] sm:$0xff] %vm2238_vm5, %v2237_v39 }
 0x4bb PF: > { %s23_s16 = sadd.s32 1, %s2985_s16   ;;  %s4358_s3 = sld [smem:[#allocation9_spill]] }
 0x4bc   : > { %p20_p1 = scmp.ge.s32.totalorder %s23_s16, 14   ;;  %s4359_s21 = sld [smem:[#allocation10_spill]] }
 0x4bd   : > { %s4360_s30 = smov %s2961_s10  ;;  %s4361_s10 = smov %s2965_s11 }
 0x4be   : > { %s4362_s11 = smov %s3137_s20  ;;  %s4363_s12 = smov %s2977_s14 }
 0x4bf   : > { %s4364_s13 = smov %s2981_s15  ;;  %22 = sbr.rel (!%p20_p1) target bundleno = 14 (0xe), region = 108 }
 0x4c1   : > { %s4365_s14 = smov %s4358_s3 }
 0x4c2   : > { %s4366_s15 = smov %s4359_s21 }
 0x4c4   :  { %2324 = vsyncpa [#allocation3], 1 }
 0x4c5   :  { %2326 = vsyncpa [#allocation3 + $0x1], 1 }
 0x4c6   :  { %2327 = vsyncpa [#allocation5], 1 }

</bundles_post_ra>
